<compile_context>
chip_gen: v7x
topology: tpu7x:2x2x1
jax: 0.10.0
libtpu: 0.0.40
codegen_flags: <defaults>
</compile_context>

<pallas_src>
import jax
import jax.numpy as jnp
from jax.experimental import pallas as pl
from jax.experimental.pallas import tpu as pltpu


LATENT_SIZE = 24
NUM_ACTIONS = 8
HIDDEN = 512
INPUT_DIM = LATENT_SIZE + NUM_ACTIONS   # 32
OUTPUT_DIM = LATENT_SIZE                # 24
OUT_PAD = 128                           # lane-dense output slab width
BIAS_LEN = 4 * HIDDEN + OUT_PAD         # b1(1024) | b2m(512) | b2s(512) | b3(128)


def _round_up(a, m):
    return (a + m - 1) // m * m


def _softplus(z):
    # Matches torch.nn.Softplus (beta=1, threshold=20):
    #   z > 20 -> z ; else -> log(1 + exp(z))
    return jnp.where(z > 20.0, z, jnp.log1p(jnp.exp(jnp.minimum(z, 20.0))))


def eppm_kernel(state_ref, action_ref, w1s_ref, w1a_ref, w2_ref, w3_ref,
                bias_ref, out_ref):
    # Cast activations to bf16 for the MXU; all accumulation stays f32.
    s = state_ref[...].astype(jnp.bfloat16)                 # (TB, 24)
    a = action_ref[...].astype(jnp.bfloat16)                # (TB, 8)

    # Packed f32 bias slab (all boundaries are multiples of 128 lanes).
    b1 = bias_ref[:, 0:2 * HIDDEN]                          # (1, 1024) mean|std
    b2m = bias_ref[:, 2 * HIDDEN:3 * HIDDEN]                # (1, 512)
    b2s = bias_ref[:, 3 * HIDDEN:4 * HIDDEN]                # (1, 512)
    b3 = bias_ref[:, 4 * HIDDEN:4 * HIDDEN + OUT_PAD]       # (1, 128) mean|std

    # ----- layer 1 (fused across branches, split across state/action) -----
    hg = (jnp.dot(s, w1s_ref[...], preferred_element_type=jnp.float32)
          + jnp.dot(a, w1a_ref[...], preferred_element_type=jnp.float32)
          + b1)
    hg = jnp.maximum(hg, 0.0).astype(jnp.bfloat16)          # (TB, 1024)
    h = hg[:, :HIDDEN]                                      # mean branch hidden
    g = hg[:, HIDDEN:]                                      # std  branch hidden

    # ----- layer 2 per branch: full 512x512 bf16 MXU matmuls -----
    h2 = jnp.maximum(
        jnp.dot(h, w2_ref[0], preferred_element_type=jnp.float32) + b2m,
        0.0).astype(jnp.bfloat16)
    g2 = jnp.maximum(
        jnp.dot(g, w2_ref[1], preferred_element_type=jnp.float32) + b2s,
        0.0).astype(jnp.bfloat16)

    # ----- layer 3 (fused, zero-padded to 128 lanes) -----
    # w3[0] has the mean head in lanes 0:24, w3[1] the std head in lanes 24:48;
    # summing the two matmul results gives one lane-dense (TB, 128) slab.
    z = (jnp.dot(h2, w3_ref[0], preferred_element_type=jnp.float32)
         + jnp.dot(g2, w3_ref[1], preferred_element_type=jnp.float32)
         + b3)

    # Apply Softplus + 1e-6 only to the std lanes (24:48) via a lane mask so
    # the store stays full-width and unmasked.
    lane = jax.lax.broadcasted_iota(jnp.int32, z.shape, 1)
    is_std = (lane >= OUTPUT_DIM) & (lane < 2 * OUTPUT_DIM)
    out_ref[...] = jnp.where(is_std, _softplus(z) + 1e-6, z).astype(out_ref.dtype)


def _choose_tile(b_pad8):
    """Batch tile: single tile for small batches; for large batches use up to
    512 rows while keeping >= 2 grid steps (so the 'parallel' axis can shard
    across v7x's two TensorCores)."""
    if b_pad8 <= 256:
        return b_pad8
    half = _round_up((b_pad8 + 1) // 2, 8)
    return min(512, half)


def eppm_forward(state, action, packed_params, return_packed=False):
    """Returns (mean, std) of the predicted Normal distribution.

    state:  (B, LATENT_SIZE) float32
    action: (B, NUM_ACTIONS) float32
    packed_params: dict produced by pack_params().
    return_packed: if True, return the raw (b_pad, 128) slab (mean in lanes
        0:24, std in lanes 24:48) and skip the wrapper-side slicing copies.
    """
    b = state.shape[0]
    b_pad8 = _round_up(b, 8)
    tb = _choose_tile(b_pad8)
    b_pad = _round_up(b, tb)
    if b_pad != b:
        pad = ((0, b_pad - b), (0, 0))
        state = jnp.pad(state, pad)
        action = jnp.pad(action, pad)

    w1_state = packed_params["w1_state"]   # (24, 1024) bf16
    w1_action = packed_params["w1_action"] # (8, 1024)  bf16
    w2 = packed_params["w2"]               # (2, 512, 512) bf16
    w3 = packed_params["w3"]               # (2, 512, 128) bf16
    bias = packed_params["bias"]           # (1, 2176) f32

    grid = (b_pad // tb,)

    slab = pl.pallas_call(
        eppm_kernel,
        grid=grid,
        in_specs=[
            pl.BlockSpec((tb, LATENT_SIZE), lambda i: (i, 0)),
            pl.BlockSpec((tb, NUM_ACTIONS), lambda i: (i, 0)),
            # Weights/biases: constant block index -> stay VMEM-resident
            # across the batch grid.
            pl.BlockSpec((LATENT_SIZE, 2 * HIDDEN), lambda i: (0, 0)),
            pl.BlockSpec((NUM_ACTIONS, 2 * HIDDEN), lambda i: (0, 0)),
            pl.BlockSpec((2, HIDDEN, HIDDEN), lambda i: (0, 0, 0)),
            pl.BlockSpec((2, HIDDEN, OUT_PAD), lambda i: (0, 0, 0)),
            pl.BlockSpec((1, BIAS_LEN), lambda i: (0, 0)),
        ],
        out_specs=pl.BlockSpec((tb, OUT_PAD), lambda i: (i, 0)),
        out_shape=jax.ShapeDtypeStruct((b_pad, OUT_PAD), jnp.float32),
        compiler_params=pltpu.CompilerParams(
            dimension_semantics=("parallel",),
            vmem_limit_bytes=32 << 20,
        ),
    )(state, action, w1_state, w1_action, w2, w3, bias)

    if return_packed:
        return slab
    mean = slab[:b, :OUTPUT_DIM]
    std = slab[:b, OUTPUT_DIM:2 * OUTPUT_DIM]
    return mean, std


def init_params(key):
    """Deterministic synthetic parameter init (shapes match the PyTorch module).

    nn.Linear weights are (out, in); we store them transposed as (in, out).
    Biases are stored as (1, out) so they broadcast over the batch.
    """
    def linear(k, fan_in, fan_out):
        kw, kb = jax.random.split(k)
        bound = 1.0 / jnp.sqrt(float(fan_in))
        w = jax.random.uniform(kw, (fan_in, fan_out), jnp.float32, -bound, bound)
        bvec = jax.random.uniform(kb, (1, fan_out), jnp.float32, -bound, bound)
        return w, bvec

    keys = jax.random.split(key, 6)
    w1m, b1m = linear(keys[0], INPUT_DIM, HIDDEN)
    w2m, b2m = linear(keys[1], HIDDEN, HIDDEN)
    w3m, b3m = linear(keys[2], HIDDEN, OUTPUT_DIM)
    w1s, b1s = linear(keys[3], INPUT_DIM, HIDDEN)
    w2s, b2s = linear(keys[4], HIDDEN, HIDDEN)
    w3s, b3s = linear(keys[5], HIDDEN, OUTPUT_DIM)
    return dict(
        w1m=w1m, b1m=b1m, w2m=w2m, b2m=b2m, w3m=w3m, b3m=b3m,
        w1s=w1s, b1s=b1s, w2s=w2s, b2s=b2s, w3s=w3s, b3s=b3s,
    )


def pack_params(p):
    """Fuse the 12 per-layer arrays into 5 kernel-friendly packed arrays.

    Weights are stored in bf16 (f32 accumulation in-kernel); biases stay f32.
    """
    # Layer 1: shared input -> fuse output lanes (mean | std), then split the
    # input rows into state/action parts so no wrapper-side concat is needed.
    w1 = jnp.concatenate([p["w1m"], p["w1s"]], axis=1)          # (32, 1024)
    w1_state = w1[:LATENT_SIZE].astype(jnp.bfloat16)            # (24, 1024)
    w1_action = w1[LATENT_SIZE:].astype(jnp.bfloat16)           # (8, 1024)
    # Layer 2: stack the two 512x512 weights (one DMA, indexed in-kernel).
    w2 = jnp.stack([p["w2m"], p["w2s"]], axis=0).astype(jnp.bfloat16)
    # Layer 3: zero-pad to 128 lanes; mean head -> lanes 0:24, std -> 24:48.
    w3 = jnp.zeros((2, HIDDEN, OUT_PAD), jnp.float32)
    w3 = w3.at[0, :, :OUTPUT_DIM].set(p["w3m"])
    w3 = w3.at[1, :, OUTPUT_DIM:2 * OUTPUT_DIM].set(p["w3s"])
    w3 = w3.astype(jnp.bfloat16)
    # One f32 bias slab (all segment boundaries are multiples of 128 lanes).
    b3 = jnp.zeros((1, OUT_PAD), jnp.float32)
    b3 = b3.at[:, :OUTPUT_DIM].set(p["b3m"])
    b3 = b3.at[:, OUTPUT_DIM:2 * OUTPUT_DIM].set(p["b3s"])
    bias = jnp.concatenate([p["b1m"], p["b1s"], p["b2m"], p["b2s"], b3], axis=1)
    return dict(w1_state=w1_state, w1_action=w1_action, w2=w2, w3=w3, bias=bias)


def eppm_reference(state, action, p, matmul_dtype=jnp.float32):
    """Pure-JAX reference (unfused parameters) for correctness checking.

    matmul_dtype=jnp.bfloat16 mimics the kernel's bf16-operand / f32-accum
    matmuls so it can be compared with a tight tolerance.
    """
    x = jnp.concatenate([state, action], axis=1)

    def mlp(x, w1, b1, w2, b2, w3, b3):
        def mm(a, w):
            return jnp.dot(a.astype(matmul_dtype), w.astype(matmul_dtype),
                           preferred_element_type=jnp.float32)
        h = jnp.maximum(mm(x, w1) + b1, 0.0)
        h = jnp.maximum(mm(h, w2) + b2, 0.0)
        return mm(h, w3) + b3

    u = mlp(x, p["w1m"], p["b1m"], p["w2m"], p["b2m"], p["w3m"], p["b3m"])
    z = mlp(x, p["w1s"], p["b1s"], p["w2s"], p["b2s"], p["w3s"], p["b3s"])
    std = jax.nn.softplus(z) + 1e-6
    return u, std


if __name__ == "__main__":
    key = jax.random.PRNGKey(0)
    k_params, k_state, k_action = jax.random.split(key, 3)

    params = init_params(k_params)
    packed = pack_params(params)

    fwd = jax.jit(eppm_forward)

    # Small batch (single tile) and a larger batch (exercises grid=2 + padding).
    for B in (8, 300):
        ks, ka = jax.random.split(jax.random.fold_in(k_state, B))
        state = jax.random.normal(ks, (B, LATENT_SIZE), jnp.float32)
        action = jax.random.normal(ka, (B, NUM_ACTIONS), jnp.float32)

        mean, std = jax.block_until_ready(fwd(state, action, packed))

        # Tight check against a bf16-operand reference (same numerics as kernel).
        ref_mean_bf, ref_std_bf = eppm_reference(state, action, params,
                                                 matmul_dtype=jnp.bfloat16)
        assert jnp.allclose(mean, ref_mean_bf, atol=2e-3, rtol=2e-3)
        assert jnp.allclose(std, ref_std_bf, atol=2e-3, rtol=2e-3)

        # Looser semantic check against the full-f32 reference (bf16 weights
        # introduce ~1% relative error on this tiny MLP).
        ref_mean, ref_std = eppm_reference(state, action, params)
        assert jnp.allclose(mean, ref_mean, atol=5e-2, rtol=5e-2)
        assert jnp.allclose(std, ref_std, atol=5e-2, rtol=5e-2)
        assert bool(jnp.all(std > 0))

    # TODO(synk): torch.distributions.Normal is a distribution object; the kernel
    # returns its (mean, std) parameterization instead.
    print("KERNEL_OK")
</pallas_src>

<mosaic_0001>
module attributes {stable_mosaic.version = 11 : i64} {
  func.func @eppm_kernel(%arg0: i32, %arg1: memref<8x24xf32, #tpu.memory_space<vmem>>, %arg2: memref<8x8xf32, #tpu.memory_space<vmem>>, %arg3: memref<24x1024xbf16, #tpu.memory_space<vmem>>, %arg4: memref<8x1024xbf16, #tpu.memory_space<vmem>>, %arg5: memref<2x512x512xbf16, #tpu.memory_space<vmem>>, %arg6: memref<2x512x128xbf16, #tpu.memory_space<vmem>>, %arg7: memref<1x2176xf32, #tpu.memory_space<vmem>>, %arg8: memref<8x128xf32, #tpu.memory_space<vmem>>) attributes {dimension_semantics = [#tpu.dimension_semantics<parallel>], iteration_bounds = array<i64: 1>, scalar_prefetch = 0 : i64, scratch_operands = 0 : i64, tpu.core_type = #tpu.core_type<tc>, window_params = [{transform_indices = @transform_0, window_bounds = array<i64: 8, 24>}, {transform_indices = @transform_1, window_bounds = array<i64: 8, 8>}, {pipeline_mode = #tpu.pipeline_mode<synchronous>, transform_indices = @transform_2, window_bounds = array<i64: 24, 1024>}, {pipeline_mode = #tpu.pipeline_mode<synchronous>, transform_indices = @transform_3, window_bounds = array<i64: 8, 1024>}, {pipeline_mode = #tpu.pipeline_mode<synchronous>, transform_indices = @transform_4, window_bounds = array<i64: 2, 512, 512>}, {pipeline_mode = #tpu.pipeline_mode<synchronous>, transform_indices = @transform_5, window_bounds = array<i64: 2, 512, 128>}, {pipeline_mode = #tpu.pipeline_mode<synchronous>, transform_indices = @transform_6, window_bounds = array<i64: 1, 2176>}, {transform_indices = @transform_7, window_bounds = array<i64: 8, 128>}]} {
    %c0 = arith.constant 0 : index
    %c0_0 = arith.constant 0 : index
    %0 = vector.load %arg1[%c0, %c0_0] : memref<8x24xf32, #tpu.memory_space<vmem>>, vector<8x24xf32>
    %1 = arith.truncf %0 : vector<8x24xf32> to vector<8x24xbf16>
    %c0_1 = arith.constant 0 : index
    %c0_2 = arith.constant 0 : index
    %2 = vector.load %arg2[%c0_1, %c0_2] : memref<8x8xf32, #tpu.memory_space<vmem>>, vector<8x8xf32>
    %3 = arith.truncf %2 : vector<8x8xf32> to vector<8x8xbf16>
    %c0_3 = arith.constant 0 : index
    %c0_4 = arith.constant 0 : index
    %4 = vector.load %arg7[%c0_3, %c0_4] : memref<1x2176xf32, #tpu.memory_space<vmem>>, vector<1x1024xf32>
    %c0_5 = arith.constant 0 : index
    %c1024 = arith.constant 1024 : index
    %5 = vector.load %arg7[%c0_5, %c1024] : memref<1x2176xf32, #tpu.memory_space<vmem>>, vector<1x512xf32>
    %c0_6 = arith.constant 0 : index
    %c1536 = arith.constant 1536 : index
    %6 = vector.load %arg7[%c0_6, %c1536] : memref<1x2176xf32, #tpu.memory_space<vmem>>, vector<1x512xf32>
    %c0_7 = arith.constant 0 : index
    %c2048 = arith.constant 2048 : index
    %7 = vector.load %arg7[%c0_7, %c2048] : memref<1x2176xf32, #tpu.memory_space<vmem>>, vector<1x128xf32>
    %c0_8 = arith.constant 0 : index
    %c0_9 = arith.constant 0 : index
    %8 = vector.load %arg3[%c0_8, %c0_9] : memref<24x1024xbf16, #tpu.memory_space<vmem>>, vector<24x1024xbf16>
    %cst = arith.constant dense<0.000000e+00> : vector<8x1024xf32>
    %9 = tpu.matmul %1, %8, %cst {dimension_numbers = #tpu.dot_dimension_numbers<[1], [0], [0], [1], [0, 0, 1, 1], [], []>} : vector<8x24xbf16>, vector<24x1024xbf16>, vector<8x1024xf32> -> vector<8x1024xf32>
    %c0_10 = arith.constant 0 : index
    %c0_11 = arith.constant 0 : index
    %10 = vector.load %arg4[%c0_10, %c0_11] : memref<8x1024xbf16, #tpu.memory_space<vmem>>, vector<8x1024xbf16>
    %cst_12 = arith.constant dense<0.000000e+00> : vector<8x1024xf32>
    %11 = tpu.matmul %3, %10, %cst_12 {dimension_numbers = #tpu.dot_dimension_numbers<[1], [0], [0], [1], [0, 0, 1, 1], [], []>} : vector<8x8xbf16>, vector<8x1024xbf16>, vector<8x1024xf32> -> vector<8x1024xf32>
    %12 = arith.addf %9, %11 : vector<8x1024xf32>
    %13 = vector.broadcast %4 : vector<1x1024xf32> to vector<8x1024xf32>
    %14 = arith.addf %12, %13 : vector<8x1024xf32>
    %cst_13 = arith.constant 0.000000e+00 : f32
    %15 = vector.broadcast %cst_13 : f32 to vector<8x1024xf32>
    %16 = arith.maximumf %14, %15 : vector<8x1024xf32>
    %17 = arith.truncf %16 : vector<8x1024xf32> to vector<8x1024xbf16>
    %18 = vector.extract_strided_slice %17 {offsets = [0, 0], sizes = [8, 512], strides = [1, 1]} : vector<8x1024xbf16> to vector<8x512xbf16>
    %19 = vector.extract_strided_slice %17 {offsets = [0, 512], sizes = [8, 512], strides = [1, 1]} : vector<8x1024xbf16> to vector<8x512xbf16>
    %c0_14 = arith.constant 0 : index
    %c0_15 = arith.constant 0 : index
    %c0_16 = arith.constant 0 : index
    %20 = vector.load %arg5[%c0_14, %c0_15, %c0_16] : memref<2x512x512xbf16, #tpu.memory_space<vmem>>, vector<1x512x512xbf16>
    %21 = vector.shape_cast %20 : vector<1x512x512xbf16> to vector<512x512xbf16>
    %cst_17 = arith.constant dense<0.000000e+00> : vector<8x512xf32>
    %22 = tpu.matmul %18, %21, %cst_17 {dimension_numbers = #tpu.dot_dimension_numbers<[1], [0], [0], [1], [0, 0, 1, 1], [], []>} : vector<8x512xbf16>, vector<512x512xbf16>, vector<8x512xf32> -> vector<8x512xf32>
    %23 = vector.broadcast %5 : vector<1x512xf32> to vector<8x512xf32>
    %24 = arith.addf %22, %23 : vector<8x512xf32>
    %cst_18 = arith.constant 0.000000e+00 : f32
    %25 = vector.broadcast %cst_18 : f32 to vector<8x512xf32>
    %26 = arith.maximumf %24, %25 : vector<8x512xf32>
    %27 = arith.truncf %26 : vector<8x512xf32> to vector<8x512xbf16>
    %c1 = arith.constant 1 : index
    %c0_19 = arith.constant 0 : index
    %c0_20 = arith.constant 0 : index
    %28 = vector.load %arg5[%c1, %c0_19, %c0_20] : memref<2x512x512xbf16, #tpu.memory_space<vmem>>, vector<1x512x512xbf16>
    %29 = vector.shape_cast %28 : vector<1x512x512xbf16> to vector<512x512xbf16>
    %cst_21 = arith.constant dense<0.000000e+00> : vector<8x512xf32>
    %30 = tpu.matmul %19, %29, %cst_21 {dimension_numbers = #tpu.dot_dimension_numbers<[1], [0], [0], [1], [0, 0, 1, 1], [], []>} : vector<8x512xbf16>, vector<512x512xbf16>, vector<8x512xf32> -> vector<8x512xf32>
    %31 = vector.broadcast %6 : vector<1x512xf32> to vector<8x512xf32>
    %32 = arith.addf %30, %31 : vector<8x512xf32>
    %cst_22 = arith.constant 0.000000e+00 : f32
    %33 = vector.broadcast %cst_22 : f32 to vector<8x512xf32>
    %34 = arith.maximumf %32, %33 : vector<8x512xf32>
    %35 = arith.truncf %34 : vector<8x512xf32> to vector<8x512xbf16>
    %c0_23 = arith.constant 0 : index
    %c0_24 = arith.constant 0 : index
    %c0_25 = arith.constant 0 : index
    %36 = vector.load %arg6[%c0_23, %c0_24, %c0_25] : memref<2x512x128xbf16, #tpu.memory_space<vmem>>, vector<1x512x128xbf16>
    %37 = vector.shape_cast %36 : vector<1x512x128xbf16> to vector<512x128xbf16>
    %cst_26 = arith.constant dense<0.000000e+00> : vector<8x128xf32>
    %38 = tpu.matmul %27, %37, %cst_26 {dimension_numbers = #tpu.dot_dimension_numbers<[1], [0], [0], [1], [0, 0, 1, 1], [], []>} : vector<8x512xbf16>, vector<512x128xbf16>, vector<8x128xf32> -> vector<8x128xf32>
    %c1_27 = arith.constant 1 : index
    %c0_28 = arith.constant 0 : index
    %c0_29 = arith.constant 0 : index
    %39 = vector.load %arg6[%c1_27, %c0_28, %c0_29] : memref<2x512x128xbf16, #tpu.memory_space<vmem>>, vector<1x512x128xbf16>
    %40 = vector.shape_cast %39 : vector<1x512x128xbf16> to vector<512x128xbf16>
    %cst_30 = arith.constant dense<0.000000e+00> : vector<8x128xf32>
    %41 = tpu.matmul %35, %40, %cst_30 {dimension_numbers = #tpu.dot_dimension_numbers<[1], [0], [0], [1], [0, 0, 1, 1], [], []>} : vector<8x512xbf16>, vector<512x128xbf16>, vector<8x128xf32> -> vector<8x128xf32>
    %42 = arith.addf %38, %41 : vector<8x128xf32>
    %43 = vector.broadcast %7 : vector<1x128xf32> to vector<8x128xf32>
    %44 = arith.addf %42, %43 : vector<8x128xf32>
    %45 = tpu.iota {dimensions = array<i32: 1>} : vector<8x128xi32>
    %c24_i32 = arith.constant 24 : i32
    %46 = vector.broadcast %c24_i32 : i32 to vector<8x128xi32>
    %47 = arith.cmpi sge, %45, %46 : vector<8x128xi32>
    %c48_i32 = arith.constant 48 : i32
    %48 = vector.broadcast %c48_i32 : i32 to vector<8x128xi32>
    %49 = arith.cmpi slt, %45, %48 : vector<8x128xi32>
    %50 = arith.andi %47, %49 : vector<8x128xi1>
    %cst_31 = arith.constant 2.000000e+01 : f32
    %51 = vector.broadcast %cst_31 : f32 to vector<8x128xf32>
    %52 = arith.cmpf ogt, %44, %51 : vector<8x128xf32>
    %cst_32 = arith.constant 2.000000e+01 : f32
    %53 = vector.broadcast %cst_32 : f32 to vector<8x128xf32>
    %54 = arith.minimumf %44, %53 : vector<8x128xf32>
    %55 = math.exp %54 : vector<8x128xf32>
    %56 = math.log1p %55 : vector<8x128xf32>
    %57 = arith.select %52, %44, %56 : vector<8x128xi1>, vector<8x128xf32>
    %cst_33 = arith.constant 9.99999997E-7 : f32
    %58 = vector.broadcast %cst_33 : f32 to vector<8x128xf32>
    %59 = arith.addf %57, %58 : vector<8x128xf32>
    %60 = arith.select %50, %59, %44 : vector<8x128xi1>, vector<8x128xf32>
    %c0_34 = arith.constant 0 : index
    %c0_35 = arith.constant 0 : index
    %61 = vector.load %arg8[%c0_34, %c0_35] : memref<8x128xf32, #tpu.memory_space<vmem>>, vector<8x128xf32>
    tpu.vector_store %arg8[%c0_34, %c0_35], %60 {strides = array<i32>} : memref<8x128xf32, #tpu.memory_space<vmem>>, vector<8x128xf32>,
    return
  }
  func.func @transform_0(%arg0: i32) -> (i32, i32) {
    %c0_i32 = arith.constant 0 : i32
    %c0_i32_0 = arith.constant 0 : i32
    return %arg0, %c0_i32 : i32, i32
  }
  func.func @transform_1(%arg0: i32) -> (i32, i32) {
    %c0_i32 = arith.constant 0 : i32
    %c0_i32_0 = arith.constant 0 : i32
    return %arg0, %c0_i32 : i32, i32
  }
  func.func @transform_2(%arg0: i32) -> (i32, i32) {
    %c0_i32 = arith.constant 0 : i32
    %c0_i32_0 = arith.constant 0 : i32
    %c0_i32_1 = arith.constant 0 : i32
    return %c0_i32, %c0_i32_0 : i32, i32
  }
  func.func @transform_3(%arg0: i32) -> (i32, i32) {
    %c0_i32 = arith.constant 0 : i32
    %c0_i32_0 = arith.constant 0 : i32
    %c0_i32_1 = arith.constant 0 : i32
    return %c0_i32, %c0_i32_0 : i32, i32
  }
  func.func @transform_4(%arg0: i32) -> (i32, i32, i32) {
    %c0_i32 = arith.constant 0 : i32
    %c0_i32_0 = arith.constant 0 : i32
    %c0_i32_1 = arith.constant 0 : i32
    %c0_i32_2 = arith.constant 0 : i32
    return %c0_i32, %c0_i32_0, %c0_i32_1 : i32, i32, i32
  }
  func.func @transform_5(%arg0: i32) -> (i32, i32, i32) {
    %c0_i32 = arith.constant 0 : i32
    %c0_i32_0 = arith.constant 0 : i32
    %c0_i32_1 = arith.constant 0 : i32
    %c0_i32_2 = arith.constant 0 : i32
    return %c0_i32, %c0_i32_0, %c0_i32_1 : i32, i32, i32
  }
  func.func @transform_6(%arg0: i32) -> (i32, i32) {
    %c0_i32 = arith.constant 0 : i32
    %c0_i32_0 = arith.constant 0 : i32
    %c0_i32_1 = arith.constant 0 : i32
    return %c0_i32, %c0_i32_0 : i32, i32
  }
  func.func @transform_7(%arg0: i32) -> (i32, i32) {
    %c0_i32 = arith.constant 0 : i32
    %c0_i32_0 = arith.constant 0 : i32
    return %arg0, %c0_i32 : i32, i32
  }
}

</mosaic_0001>

<bundles_post_ra>
// kernel: eppm_forward.1
= control target key start
LH: loop header
LB: loop body
LE: loop exit
PB: predicated region body
PF: predicated region fallthrough
CT: control target
= control target key end

     0   :  { %12 = vsyncpa [#allocation3], 0  ;;  %s4662_s0 = inlined_call_operand.hbm [shape: f32[8,24], index: 0, kind: input, shape index: {}]   ;;  %s4663_s1 = inlined_call_operand.hbm [shape: f32[8,8], index: 1, kind: input, shape index: {}]   ;;  %s4664_s2 = inlined_call_operand.hbm [shape: bf16[24,1024], index: 2, kind: input, shape index: {}]   ;;  %s4665_s3 = inlined_call_operand.hbm [shape: bf16[8,1024], index: 3, kind: input, shape index: {}]   ;;  %s4666_s4 = inlined_call_operand.hbm [shape: bf16[2,512,512], index: 4, kind: input, shape index: {}]   ;;  %s4667_s5 = inlined_call_operand.hbm [shape: bf16[2,512,128], index: 5, kind: input, shape index: {}]   ;;  %s4668_s6 = inlined_call_operand.hbm [shape: f32[1,2176], index: 6, kind: input, shape index: {}]   ;;  %s4669_s7 = inlined_call_operand.vmem [shape: f32[8,128], index: 7, kind: output, shape index: {}]  }
   0x1   :  { %13 = vsyncpa [#allocation5], 0 }
   0x2   :  { %14 = vsyncpa [#allocation8], 0 }
   0x3   :  { %15 = vsyncpa [#allocation11], 0  ;;  %s4418_s24 = smov [#allocation4]   ;;  %s4419_s26 = smov [#allocation7]  }
   0x4   :  { %s32_s25 = sshll.u32 %s4418_s24, 4  ;;  %s54_s27 = sshll.u32 %s4419_s26, 4  ;;  %s33_s25 = int_to_ptr.vmem [resolvable:$true] %s32_s25  ;;  %s55_s27 = int_to_ptr.vmem [resolvable:$true] %s54_s27 }
   0x5   :  { %s4256_s30 = scalar_lea.hbm %s4663_s1, 128 }
   0x6   :  { %p4257_p0 = scmp.ne.s32.totalorder %s4663_s1, %s4256_s30  ;;  %p4260_p1 = scmp.lt.u32.totalorder %s4256_s30, %s4663_s1 }
   0x8   :  { %p4262_p2 = pnand %p4260_p1, %p4257_p0 }
   0xa   :  { %4265 = shalt.err (!%p4262_p2)
}
   0xb   :  { %s4266_s12 = scalar_lea.vmem %s33_s25, 128  ;;  %p4271_p4 = scmp.lt.s32.totalorder %s33_s25, %s33_s25 }
   0xc   :  { %p4267_p3 = scmp.ne.s32.totalorder %s33_s25, %s4266_s12  ;;  %p4272_p5 = scmp.lt.s32.totalorder %s4266_s12, %s4266_s12 }
   0xe   :  { %p4273_p6 = por %p4272_p5, %p4271_p4 }
  0x10   :  { %p4274_p7 = pnand %p4273_p6, %p4267_p3 }
  0x12   :  { %4277 = shalt.err (!%p4274_p7)
}
  0x13   :  { %35 = dma.hbm_to_vmem [thread:$0]  %s4663_s1, 128, %s33_s25, [#allocation5]  }
  0x14   :  { %s4278_s17 = scalar_lea.hbm %s4665_s3, 512 }
  0x15   :  { %p4279_p8 = scmp.ne.s32.totalorder %s4665_s3, %s4278_s17  ;;  %p4282_p9 = scmp.lt.u32.totalorder %s4278_s17, %s4665_s3 }
  0x17   :  { %p4284_p10 = pnand %p4282_p9, %p4279_p8 }
  0x19   :  { %4287 = shalt.err (!%p4284_p10)
}
  0x1a   :  { %s4288_s22 = scalar_lea.vmem %s55_s27, 512  ;;  %p4293_p12 = scmp.lt.s32.totalorder %s55_s27, %s55_s27 }
  0x1b   :  { %p4289_p11 = scmp.ne.s32.totalorder %s55_s27, %s4288_s22  ;;  %p4294_p13 = scmp.lt.s32.totalorder %s4288_s22, %s4288_s22 }
  0x1d   :  { %p4295_p0 = por %p4294_p13, %p4293_p12 }
  0x1f   :  { %p4296_p1 = pnand %p4295_p0, %p4289_p11 }
  0x21   :  { %4299 = shalt.err (!%p4296_p1)
}
  0x22   :  { %57 = dma.hbm_to_vmem [thread:$0]  %s4665_s3, 512, %s55_s27, [#allocation8]  }
  0x23   :  { %s4420_s24 = smov [#allocation10]   ;;  %s4300_s29 = scalar_lea.hbm %s4667_s5, 8192 }
  0x24   :  { %s75_s25 = sshll.u32 %s4420_s24, 4  ;;  %p4301_p2 = scmp.ne.s32.totalorder %s4667_s5, %s4300_s29  ;;  %s76_s25 = int_to_ptr.vmem [resolvable:$true] %s75_s25 }
  0x25   :  { %p4304_p3 = scmp.lt.u32.totalorder %s4300_s29, %s4667_s5 }
  0x27   :  { %p4306_p4 = pnand %p4304_p3, %p4301_p2 }
  0x29   :  { %4309 = shalt.err (!%p4306_p4)
}
  0x2a   :  { %s4310_s11 = scalar_lea.vmem %s76_s25, 8192  ;;  %p4315_p6 = scmp.lt.s32.totalorder %s76_s25, %s76_s25 }
  0x2b   :  { %p4311_p5 = scmp.ne.s32.totalorder %s76_s25, %s4310_s11  ;;  %p4316_p7 = scmp.lt.s32.totalorder %s4310_s11, %s4310_s11 }
  0x2d   :  { %p4317_p8 = por %p4316_p7, %p4315_p6 }
  0x2f   :  { %p4318_p9 = pnand %p4317_p8, %p4311_p5 }
  0x31   :  { %4321 = shalt.err (!%p4318_p9)
}
  0x32   :  { %s4421_s3 = smov 64   ;;  %s4422_s27 = smov 4  }
  0x33   :  { %81 = dma.hbm_to_vmem [thread:$0]  %s4667_s5, 8192, %s76_s25, [#allocation11], %s4421_s3, %s4421_s3, %s4422_s27  }
  0x34   :  { %s4423_s14 = smov [#allocation2]   ;;  %s4424_s16 = smov [#allocation6]  }
  0x35   :  { %s22_s15 = sshll.u32 %s4423_s14, 4  ;;  %s41_s17 = sshll.u32 %s4424_s16, 4  ;;  %s23_s15 = int_to_ptr.vmem [resolvable:$true] %s22_s15  ;;  %s42_s17 = int_to_ptr.vmem [resolvable:$true] %s41_s17 }
  0x36   :  { %s4322_s20 = scalar_lea.hbm %s4662_s0, 128 }
  0x37   :  { %p4323_p10 = scmp.ne.s32.totalorder %s4662_s0, %s4322_s20  ;;  %p4326_p11 = scmp.lt.u32.totalorder %s4322_s20, %s4662_s0 }
  0x39   :  { %p4328_p12 = pnand %p4326_p11, %p4323_p10 }
  0x3b   :  { %4331 = shalt.err (!%p4328_p12)
}
  0x3c   :  { %s4332_s5 = scalar_lea.vmem %s23_s15, 128  ;;  %p4337_p0 = scmp.lt.s32.totalorder %s23_s15, %s23_s15 }
  0x3d   :  { %p4333_p13 = scmp.ne.s32.totalorder %s23_s15, %s4332_s5  ;;  %p4338_p1 = scmp.lt.s32.totalorder %s4332_s5, %s4332_s5 }
  0x3f   :  { %p4339_p2 = por %p4338_p1, %p4337_p0 }
  0x41   :  { %p4340_p3 = pnand %p4339_p2, %p4333_p13 }
  0x43   :  { %4343 = shalt.err (!%p4340_p3)
}
  0x44   :  { %25 = dma.hbm_to_vmem [thread:$0]  %s4662_s0, 128, %s23_s15, [#allocation3]  }
  0x45   :  { %s4344_s29 = scalar_lea.hbm %s4664_s2, 1536 }
  0x46   :  { %p4345_p4 = scmp.ne.s32.totalorder %s4664_s2, %s4344_s29  ;;  %p4348_p5 = scmp.lt.u32.totalorder %s4344_s29, %s4664_s2 }
  0x48   :  { %p4350_p6 = pnand %p4348_p5, %p4345_p4 }
  0x4a   :  { %4353 = shalt.err (!%p4350_p6)
}
  0x4b   :  { %s4354_s11 = scalar_lea.vmem %s42_s17, 1536  ;;  %p4359_p8 = scmp.lt.s32.totalorder %s42_s17, %s42_s17 }
  0x4c   :  { %p4355_p7 = scmp.ne.s32.totalorder %s42_s17, %s4354_s11  ;;  %p4360_p9 = scmp.lt.s32.totalorder %s4354_s11, %s4354_s11 }
  0x4e   :  { %p4361_p10 = por %p4360_p9, %p4359_p8 }
  0x50   :  { %p4362_p11 = pnand %p4361_p10, %p4355_p7 }
  0x52   :  { %4365 = shalt.err (!%p4362_p11)
}
  0x53   :  { %s4425_s0 = smov 512   ;;  %s4426_s3 = smov 32  }
  0x54   :  { %47 = dma.hbm_to_vmem [thread:$0]  %s4664_s2, 1536, %s42_s17, [#allocation5], %s4425_s0, %s4425_s0, %s4426_s3  }
  0x55   :  { %s4427_s13 = smov [#allocation9]   ;;  %s4366_s18 = scalar_lea.hbm %s4666_s4, 32768 }
  0x56   :  { %s63_s14 = sshll.u32 %s4427_s13, 4  ;;  %p4367_p12 = scmp.ne.s32.totalorder %s4666_s4, %s4366_s18  ;;  %s64_s14 = int_to_ptr.vmem [resolvable:$true] %s63_s14 }
  0x57   :  { %p4370_p13 = scmp.lt.u32.totalorder %s4366_s18, %s4666_s4 }
  0x59   :  { %p4372_p0 = pnand %p4370_p13, %p4367_p12 }
  0x5b   :  { %4375 = shalt.err (!%p4372_p0)
}
  0x5c   :  { %s4376_s1 = scalar_lea.vmem %s64_s14, 32768  ;;  %p4381_p2 = scmp.lt.s32.totalorder %s64_s14, %s64_s14 }
  0x5d   :  { %p4377_p1 = scmp.ne.s32.totalorder %s64_s14, %s4376_s1  ;;  %p4382_p3 = scmp.lt.s32.totalorder %s4376_s1, %s4376_s1 }
  0x5f   :  { %p4383_p4 = por %p4382_p3, %p4381_p2 }
  0x61   :  { %p4384_p5 = pnand %p4383_p4, %p4377_p1 }
  0x63   :  { %4387 = shalt.err (!%p4384_p5)
}
  0x64   :  { %s4428_s2 = smov 256   ;;  %s4429_s17 = smov 16  }
  0x65   :  { %69 = dma.hbm_to_vmem [thread:$0]  %s4666_s4, 32768, %s64_s14, [#allocation8], %s4428_s2, %s4428_s2, %s4429_s17  }
  0x66   :  { %s4430_s24 = smov [#allocation12]   ;;  %s4388_s29 = scalar_lea.hbm %s4668_s6, 272 }
  0x67   :  { %s88_s25 = sshll.u32 %s4430_s24, 4  ;;  %p4389_p6 = scmp.ne.s32.totalorder %s4668_s6, %s4388_s29  ;;  %s89_s25 = int_to_ptr.vmem [resolvable:$true] %s88_s25 }
  0x68   :  { %p4392_p7 = scmp.lt.u32.totalorder %s4388_s29, %s4668_s6 }
  0x6a   :  { %p4394_p8 = pnand %p4392_p7, %p4389_p6 }
  0x6c   :  { %4397 = shalt.err (!%p4394_p8)
}
  0x6d   :  { %s4398_s11 = scalar_lea.vmem %s89_s25, 272  ;;  %s4402_s4 = scalar_lea.vmem %s89_s25, 288 }
  0x6e   :  { %p4399_p9 = scmp.ne.s32.totalorder %s89_s25, %s4398_s11  ;;  %p4403_p10 = scmp.lt.s32.totalorder %s89_s25, %s89_s25 }
  0x6f   :  { %p4404_p11 = scmp.lt.s32.totalorder %s4402_s4, %s4398_s11 }
  0x71   :  { %p4405_p12 = por %p4404_p11, %p4403_p10 }
  0x73   :  { %p4406_p13 = pnand %p4405_p12, %p4399_p9 }
  0x75   :  { %4409 = shalt.err (!%p4406_p13)
}
  0x76   :  { %91 = dma.hbm_to_vmem [thread:$0]  %s4668_s6, 272, %s89_s25, [#allocation11]  }
  0x77   :  { %4410 = dma.done.wait [#allocation3], 128  }
  0x78   :  { %4411 = vsyncadd [#allocation3], 4294967168 }
  0x79   :  { %4412 = dma.done.wait [#allocation5], 1664  }
  0x7a   :  { %4413 = vsyncadd [#allocation5], 4294965632 }
  0x7b   :  { %4414 = dma.done.wait [#allocation8], 33280  }
  0x7c   :  { %4415 = vsyncadd [#allocation8], 4294934016 }
  0x7d   :  { %4416 = dma.done.wait [#allocation11], 8464  }
  0x7e   :  { %4417 = vsyncadd [#allocation11], 4294958832  ;;  %v4431_v0 = vmov 0   ;;  %v134_v1 = vld [vmem:[#allocation7] sm:$0xff]  ;;  %vm162_vm0 = vcmask 1043456   ;;  %v116_v2 = vld [vmem:[#allocation4] sm:$0xff] }
  0x7f   :  { %219 = vmatprep.mubr.bf16.mxu0 %v4431_v0  ;;  %260 = vmatprep.mubr.bf16.mxu1 %v4431_v0  ;;  %v136_v3 = vld [vmem:[#allocation7 + $0x10] sm:$0xff]  ;;  %v3302_v4 = vcombine.high %v134_v1, %v134_v1  ;;  %v3301_v5 = vcombine.low %v134_v1, %v134_v1  ;;  %v122_v8 = vld [vmem:[#allocation6] sm:$0xff]  ;;  %v117_v11 = vpack.c.bf16 %v116_v2, %v116_v2  ;;  %v135_v12 = vld [vmem:[#allocation7 + $0x8] sm:$0xff]  ;;  %vm158_vm1 = vcmask 64512  }
  0x80   :  { %v3306_v6 = vcombine.high %v136_v3, %v136_v3  ;;  %v3305_v7 = vcombine.low %v136_v3, %v136_v3  ;;  %v126_v9 = vld [vmem:[#allocation6 + $0x20] sm:$0xff]  ;;  %v137_v13 = vld [vmem:[#allocation7 + $0x18] sm:$0xff]  ;;  %v3304_v16 = vcombine.high %v135_v12, %v135_v12  ;;  %v3303_v17 = vcombine.low %v135_v12, %v135_v12  ;;  %v123_v20 = vld [vmem:[#allocation6 + $0x8] sm:$0xff] }
  0x81   :  { %3309 = vmatprep.subr.msk.bf16.mxu0 %vm162_vm0, %v3302_v4  ;;  %v164_v10 = vsel %vm162_vm0, %v3301_v5, 0  ;;  %v3318_v15 = vcombine.high %v122_v8, %v126_v9  ;;  %v3308_v18 = vcombine.high %v137_v13, %v137_v13  ;;  %v3307_v19 = vcombine.low %v137_v13, %v137_v13  ;;  %v127_v22 = vld [vmem:[#allocation6 + $0x28] sm:$0xff]  ;;  %v130_v23 = vld [vmem:[#allocation6 + $0x40] sm:$0xff]  ;;  %v124_v29 = vld [vmem:[#allocation6 + $0x10] sm:$0xff] }
  0x82   :  { %188 = vmatpush1.bf16.msra.mxu0 %v164_v10  ;;  %v176_v14 = vsel %vm162_vm0, %v3305_v7, 0  ;;  %3311 = vmatprep.subr.msk.bf16.mxu1 %vm162_vm0, %v3304_v16  ;;  %v170_v21 = vsel %vm162_vm0, %v3303_v17, 0  ;;  %v3320_v25 = vcombine.high %v123_v20, %v127_v22  ;;  %v3317_v26 = vcombine.low %v122_v8, %v126_v9  ;;  %v128_v30 = vld [vmem:[#allocation6 + $0x30] sm:$0xff]  ;;  %v131_v31 = vld [vmem:[#allocation6 + $0x48] sm:$0xff]  ;;  %v125_v39 = vld [vmem:[#allocation6 + $0x18] sm:$0xff] }
  0x83   :  { %3313 = vmatprep.subr.msk.bf16.mxu0 %vm162_vm0, %v3306_v6  ;;  %229 = vmatpush1.bf16.msra.mxu1 %v170_v21  ;;  %v182_v24 = vsel %vm162_vm0, %v3307_v19, 0  ;;  %v3326_v27 = vcombine.high %v130_v23, %v130_v23  ;;  %v3325_v28 = vcombine.low %v130_v23, %v130_v23  ;;  %v114_v32 = vld [vmem:[#allocation2] sm:$0xff]  ;;  %v3322_v34 = vcombine.high %v124_v29, %v128_v30  ;;  %v129_v41 = vld [vmem:[#allocation6 + $0x38] sm:$0xff] }
  0x84   :  { %3315 = vmatprep.subr.msk.bf16.mxu1 %vm162_vm0, %v3308_v18  ;;  %v132_v35 = vld [vmem:[#allocation6 + $0x50] sm:$0xff]  ;;  %v3319_v36 = vcombine.low %v123_v20, %v127_v22  ;;  %v3328_v37 = vcombine.high %v131_v31, %v131_v31  ;;  %v3327_v38 = vcombine.low %v131_v31, %v131_v31  ;;  %v115_v40 = vpack.c.bf16 %v114_v32, %v114_v32  ;;  %v133_v47 = vld [vmem:[#allocation6 + $0x58] sm:$0xff] }
  0x85   :  { %3310 = vmatmul.mubr.msk.bf16.vlgmr.msra.gmra.mrb[0].mxu0 %vm158_vm1, %v117_v11  ;;  %v416_v33 = vsel %vm162_vm0, %v3325_v28, 0  ;;  %vm411_vm2 = vcmask 195584   ;;  %v3321_v42 = vcombine.low %v124_v29, %v128_v30  ;;  %v3330_v43 = vcombine.high %v132_v35, %v132_v35  ;;  %v3806_v52 = vld [vmem:[#allocation9 + $0x4] ss:$16 sps:$4 sm:$0xff]   ;;  %v3804_v53 = vld [vmem:[#allocation9] ss:$16 sps:$4 sm:$0xff]  }
  0x86   :  { %270 = vmatpush1.bf16.msra.mxu0 %v176_v14  ;;  %301 = vmatprep.mubr.bf16.mxu0 %v4431_v0  ;;  %v3329_v44 = vcombine.low %v132_v35, %v132_v35  ;;  %v422_v45 = vsel %vm162_vm0, %v3327_v38, 0  ;;  %v3324_v46 = vcombine.high %v125_v39, %v129_v41  ;;  %v3323_v49 = vcombine.low %v125_v39, %v129_v41  ;;  %v3812_v54 = vld [vmem:[#allocation9 + $0x24] ss:$16 sps:$4 sm:$0xff]   ;;  %v3809_v56 = vld [vmem:[#allocation9 + $0xc] ss:$16 sps:$4 sm:$0xff]  }
  0x87   :  { %439 = vmatprep.subr.bf16.mxu0 %v3318_v15  ;;  %3312 = vmatmul.mubr.msk.bf16.vlgmr.msra.gmra.mrb[0].mxu1 %vm158_vm1, %v117_v11  ;;  %v3332_v50 = vcombine.high %v133_v47, %v133_v47  ;;  %v3331_v51 = vcombine.low %v133_v47, %v133_v47  ;;  %v3807_v57 = vld [vmem:[#allocation9 + $0x8] ss:$16 sps:$4 sm:$0xff]   ;;  %v3810_v58 = vld [vmem:[#allocation9 + $0x20] ss:$16 sps:$4 sm:$0xff]   ;;  %v3815_v59 = vld [vmem:[#allocation9 + $0x2c] ss:$16 sps:$4 sm:$0xff]   ;;  %v604_v47 = vlaneseq }
  0x88   :  { %311 = vmatpush1.bf16.msra.mxu1 %v182_v24  ;;  %342 = vmatprep.mubr.bf16.mxu1 %v4431_v0  ;;  %v428_v48 = vsel %vm162_vm0, %v3329_v44, 0  ;;  %v3818_v60 = vld [vmem:[#allocation9 + $0x44] ss:$16 sps:$4 sm:$0xff]   ;;  %v3816_v61 = vld [vmem:[#allocation9 + $0x40] ss:$16 sps:$4 sm:$0xff]  }
  0x89   :  { %480 = vmatprep.subr.bf16.mxu1 %v3320_v25  ;;  %v434_v55 = vsel %vm162_vm0, %v3331_v51, 0  ;;  %v3813_v62 = vld [vmem:[#allocation9 + $0x28] ss:$16 sps:$4 sm:$0xff]   ;;  %v3824_v63 = vld [vmem:[#allocation9 + $0x64] ss:$16 sps:$4 sm:$0xff]  }
  0x8a   :  { %v3822_v1 = vld [vmem:[#allocation9 + $0x60] ss:$16 sps:$4 sm:$0xff]   ;;  %v3819_v2 = vld [vmem:[#allocation9 + $0x48] ss:$16 sps:$4 sm:$0xff]   ;;  %v3830_v3 = vld [vmem:[#allocation9 + $0x84] ss:$16 sps:$4 sm:$0xff]  }
  0x8b   :  { %v3827_v4 = vld [vmem:[#allocation9 + $0x6c] ss:$16 sps:$4 sm:$0xff]   ;;  %v3828_v5 = vld [vmem:[#allocation9 + $0x80] ss:$16 sps:$4 sm:$0xff]   ;;  %v3825_v6 = vld [vmem:[#allocation9 + $0x68] ss:$16 sps:$4 sm:$0xff]  }
  0x8c   :  { %v3836_v7 = vld [vmem:[#allocation9 + $0xa4] ss:$16 sps:$4 sm:$0xff]   ;;  %v3833_v8 = vld [vmem:[#allocation9 + $0x8c] ss:$16 sps:$4 sm:$0xff]   ;;  %v3834_v9 = vld [vmem:[#allocation9 + $0xa0] ss:$16 sps:$4 sm:$0xff]  }
  0x8d   :  { %3314 = vmatmul.mubr.msk.bf16.vlgmr.msra.gmra.mrb[4].mxu0 %vm158_vm1, %v117_v11  ;;  %v3831_v10 = vld [vmem:[#allocation9 + $0x88] ss:$16 sps:$4 sm:$0xff]   ;;  %v3839_v12 = vld [vmem:[#allocation9 + $0xac] ss:$16 sps:$4 sm:$0xff]   ;;  %v3840_v13 = vld [vmem:[#allocation9 + $0xc0] ss:$16 sps:$4 sm:$0xff]  }
  0x8e   :  { %440 = vmatpush1.bf16.msra.mxu0 %v3317_v26  ;;  %471 = vmatprep.mubr.bf16.mxu0 %v4431_v0  ;;  %v3837_v14 = vld [vmem:[#allocation9 + $0xa8] ss:$16 sps:$4 sm:$0xff]   ;;  %v3848_v15 = vld [vmem:[#allocation9 + $0xe4] ss:$16 sps:$4 sm:$0xff]   ;;  %v3845_v16 = vld [vmem:[#allocation9 + $0xcc] ss:$16 sps:$4 sm:$0xff]  }
  0x8f   :  { %3333 = vmatprep.subr.msk.bf16.mxu0 %vm162_vm0, %v3326_v27  ;;  %3316 = vmatmul.mubr.msk.bf16.vlgmr.msra.gmra.mrb[4].mxu1 %vm158_vm1, %v117_v11  ;;  %v3842_v11 = vld [vmem:[#allocation9 + $0xc4] ss:$16 sps:$4 sm:$0xff]   ;;  %v3846_v17 = vld [vmem:[#allocation9 + $0xe0] ss:$16 sps:$4 sm:$0xff]   ;;  %v3843_v18 = vld [vmem:[#allocation9 + $0xc8] ss:$16 sps:$4 sm:$0xff]  }
  0x90   :  { %481 = vmatpush1.bf16.msra.mxu1 %v3319_v36  ;;  %512 = vmatprep.mubr.bf16.mxu1 %v4431_v0  ;;  %v3854_v19 = vld [vmem:[#allocation9 + $0x104] ss:$16 sps:$4 sm:$0xff]   ;;  %v3851_v20 = vld [vmem:[#allocation9 + $0xec] ss:$16 sps:$4 sm:$0xff]   ;;  %v3852_v21 = vld [vmem:[#allocation9 + $0x100] ss:$16 sps:$4 sm:$0xff]  }
  0x91   :  { %3335 = vmatprep.subr.msk.bf16.mxu1 %vm162_vm0, %v3328_v37  ;;  %v3849_v22 = vld [vmem:[#allocation9 + $0xe8] ss:$16 sps:$4 sm:$0xff]   ;;  %v3860_v23 = vld [vmem:[#allocation9 + $0x124] ss:$16 sps:$4 sm:$0xff]   ;;  %v3857_v24 = vld [vmem:[#allocation9 + $0x10c] ss:$16 sps:$4 sm:$0xff]  }
  0x92   :  { %442 = vmatpush1.bf16.msra.mxu0 %v416_v33  ;;  %v3858_v25 = vld [vmem:[#allocation9 + $0x120] ss:$16 sps:$4 sm:$0xff]   ;;  %v3855_v26 = vld [vmem:[#allocation9 + $0x108] ss:$16 sps:$4 sm:$0xff]   ;;  %v3863_v27 = vld [vmem:[#allocation9 + $0x12c] ss:$16 sps:$4 sm:$0xff]  }
  0x93   :  { %521 = vmatprep.subr.bf16.mxu0 %v3322_v34  ;;  %v3861_v28 = vld [vmem:[#allocation9 + $0x128] ss:$16 sps:$4 sm:$0xff]   ;;  %v3866_v29 = vld [vmem:[#allocation9 + $0x144] ss:$16 sps:$4 sm:$0xff]   ;;  %v3869_v30 = vld [vmem:[#allocation9 + $0x14c] ss:$16 sps:$4 sm:$0xff]  }
  0x94   :  { %483 = vmatpush1.bf16.msra.mxu1 %v422_v45  ;;  %v3864_v31 = vld [vmem:[#allocation9 + $0x140] ss:$16 sps:$4 sm:$0xff]   ;;  %v3867_v32 = vld [vmem:[#allocation9 + $0x148] ss:$16 sps:$4 sm:$0xff]   ;;  %v3872_v34 = vld [vmem:[#allocation9 + $0x164] ss:$16 sps:$4 sm:$0xff]  }
  0x95   :  { %3334 = vmatmul.mubr.msk.bf16.vlgmr.msra.gmra.mrb[8].mxu0 %vm411_vm2, %v115_v40  ;;  %562 = vmatprep.subr.bf16.mxu1 %v3324_v46  ;;  %v3870_v33 = vld [vmem:[#allocation9 + $0x160] ss:$16 sps:$4 sm:$0xff]   ;;  %v3873_v35 = vld [vmem:[#allocation9 + $0x168] ss:$16 sps:$4 sm:$0xff]   ;;  %v3875_v36 = vld [vmem:[#allocation9 + $0x16c] ss:$16 sps:$4 sm:$0xff]  }
  0x96   :  { %522 = vmatpush1.bf16.msra.mxu0 %v3321_v42  ;;  %553 = vmatprep.mubr.bf16.mxu0 %v4431_v0  ;;  %v3878_v37 = vld [vmem:[#allocation9 + $0x184] ss:$16 sps:$4 sm:$0xff]   ;;  %v3881_v38 = vld [vmem:[#allocation9 + $0x18c] ss:$16 sps:$4 sm:$0xff]   ;;  %v3876_v39 = vld [vmem:[#allocation9 + $0x180] ss:$16 sps:$4 sm:$0xff]  }
  0x97   :  { %3337 = vmatprep.subr.msk.bf16.mxu0 %vm162_vm0, %v3330_v43  ;;  %3336 = vmatmul.mubr.msk.bf16.vlgmr.msra.gmra.mrb[8].mxu1 %vm411_vm2, %v115_v40  ;;  %v3882_v41 = vld [vmem:[#allocation9 + $0x1a0] ss:$16 sps:$4 sm:$0xff]   ;;  %v3884_v42 = vld [vmem:[#allocation9 + $0x1a4] ss:$16 sps:$4 sm:$0xff]   ;;  %v3885_v43 = vld [vmem:[#allocation9 + $0x1a8] ss:$16 sps:$4 sm:$0xff]  }
  0x98   :  { %563 = vmatpush1.bf16.msra.mxu1 %v3323_v49  ;;  %594 = vmatprep.mubr.bf16.mxu1 %v4431_v0  ;;  %v3821_v0 = vld [vmem:[#allocation9 + $0x4c] ss:$16 sps:$4 sm:$0xff]   ;;  %v3890_v45 = vld [vmem:[#allocation9 + $0x1c4] ss:$16 sps:$4 sm:$0xff]   ;;  %v3891_v49 = vld [vmem:[#allocation9 + $0x1c8] ss:$16 sps:$4 sm:$0xff]  }
  0x99   :  { %3339 = vmatprep.subr.msk.bf16.mxu1 %vm162_vm0, %v3332_v50  ;;  %v3887_v44 = vld [vmem:[#allocation9 + $0x1ac] ss:$16 sps:$4 sm:$0xff]   ;;  %v3896_v50 = vld [vmem:[#allocation9 + $0x1e4] ss:$16 sps:$4 sm:$0xff]  }
  0x9a   :  { %524 = vmatpush1.bf16.msra.mxu0 %v428_v48  ;;  %v3893_v46 = vld [vmem:[#allocation9 + $0x1cc] ss:$16 sps:$4 sm:$0xff]   ;;  %v3888_v48 = vld [vmem:[#allocation9 + $0x1c0] ss:$16 sps:$4 sm:$0xff]  }
  0x9b   :  { %1457 = vmatprep.subr.bf16.mxu0 %v3806_v52  ;;  %v3899_v51 = vld [vmem:[#allocation9 + $0x1ec] ss:$16 sps:$4 sm:$0xff]   ;;  %v605_v52 = vshrl.u32 %v604_v47, 7 }
  0x9c   :  { %565 = vmatpush1.bf16.msra.mxu1 %v434_v55 }
  0x9d   :  { %3338 = vmatmul.mubr.msk.bf16.vlgmr.msra.gmra.mrb[12].mxu0 %vm411_vm2, %v115_v40  ;;  %1539 = vmatprep.subr.bf16.mxu1 %v3809_v56  ;;  %v622_v55 = vsub.s32 4, %v605_v52  ;;  %v4589_v56 = vld [vmem:[#allocation12] sm:$0xff] }
  0x9e   :  { %1458 = vmatpush1.bf16.msra.mxu0 %v3804_v53  ;;  %v3894_v53 = vld [vmem:[#allocation9 + $0x1e0] ss:$16 sps:$4 sm:$0xff]  }
  0x9f   :  { %1459 = vmatprep.subr.bf16.mxu0 %v3812_v54  ;;  %3340 = vmatmul.mubr.msk.bf16.vlgmr.msra.gmra.mrb[12].mxu1 %vm411_vm2, %v115_v40  ;;  %v3879_v40 = vld [vmem:[#allocation9 + $0x188] ss:$16 sps:$4 sm:$0xff]  }
  0xa0   :  { %1540 = vmatpush1.bf16.msra.mxu1 %v3807_v57  ;;  %v3897_v54 = vld [vmem:[#allocation9 + $0x1e8] ss:$16 sps:$4 sm:$0xff]   ;;  %v626_v57 = vsub.s32 5, %v605_v52 }
  0xa1   :  { %1541 = vmatprep.subr.bf16.mxu1 %v3815_v59  ;;  %v3905_v59 = vld [vmem:[#allocation9 + $0x20c] ss:$16 sps:$4 sm:$0xff]  }
  0xa2   :  { %1460 = vmatpush1.bf16.msra.mxu0 %v3810_v58  ;;  %v3902_v58 = vld [vmem:[#allocation9 + $0x204] ss:$16 sps:$4 sm:$0xff]  }
  0xa3   :  { %1461 = vmatprep.subr.bf16.mxu0 %v3818_v60  ;;  %v4592_v60 = vrot.slane %v4589_v56, %v622_v55 }
  0xa4   :  { %1542 = vmatpush1.bf16.msra.mxu1 %v3813_v62  ;;  %v630_v62 = vsub.s32 6, %v605_v52 }
  0xa5   :  { %1543 = vmatprep.subr.bf16.mxu1 %v3821_v0 }
  0xa6   :  { %1462 = vmatpush1.bf16.msra.mxu0 %v3816_v61  ;;  %v4595_v61 = vrot.slane %v4589_v56, %v626_v57  ;;  %v4598_v0 = vrot.slane %v4589_v56, %v630_v62  ;;  %v3906_v62 = vld [vmem:[#allocation9 + $0x220] ss:$16 sps:$4 sm:$0xff]  }
  0xa7   :  { %1463 = vmatprep.subr.bf16.mxu0 %v3824_v63  ;;  %v634_v63 = vsub.s32 7, %v605_v52 }
  0xa8   :  { %1544 = vmatpush1.bf16.msra.mxu1 %v3819_v2 }
  0xa9   :  { %1545 = vmatprep.subr.bf16.mxu1 %v3827_v4 }
  0xaa   :  { %1464 = vmatpush1.bf16.msra.mxu0 %v3822_v1  ;;  %v4601_v1 = vrot.slane %v4589_v56, %v634_v63  ;;  %v3909_v63 = vld [vmem:[#allocation9 + $0x228] ss:$16 sps:$4 sm:$0xff]  }
  0xab   :  { %1465 = vmatprep.subr.bf16.mxu0 %v3830_v3 }
  0xac   :  { %1546 = vmatpush1.bf16.msra.mxu1 %v3825_v6 }
  0xad   :  { %1547 = vmatprep.subr.bf16.mxu1 %v3833_v8 }
  0xae   :  { %1466 = vmatpush1.bf16.msra.mxu0 %v3828_v5 }
  0xaf   :  { %1467 = vmatprep.subr.bf16.mxu0 %v3836_v7 }
  0xb0   :  { %1548 = vmatpush1.bf16.msra.mxu1 %v3831_v10 }
  0xb1   :  { %1549 = vmatprep.subr.bf16.mxu1 %v3839_v12 }
  0xb2   :  { %1468 = vmatpush1.bf16.msra.mxu0 %v3834_v9 }
  0xb3   :  { %1469 = vmatprep.subr.bf16.mxu0 %v3842_v11 }
  0xb4   :  { %1550 = vmatpush1.bf16.msra.mxu1 %v3837_v14  ;;  %v4603_v14 = vsub.s32 0, %v605_v52 }
  0xb5   :  { %1551 = vmatprep.subr.bf16.mxu1 %v3845_v16 }
  0xb6   :  { %1470 = vmatpush1.bf16.msra.mxu0 %v3840_v13 }
  0xb7   :  { %1471 = vmatprep.subr.bf16.mxu0 %v3848_v15  ;;  %v4605_v15 = vsub.s32 1, %v605_v52 }
  0xb8   :  { %1552 = vmatpush1.bf16.msra.mxu1 %v3843_v18  ;;  %v607_v18 = vrot.slane %v4589_v56, %v4603_v14 }
  0xb9   :  { %1553 = vmatprep.subr.bf16.mxu1 %v3851_v20 }
  0xba   :  { %1472 = vmatpush1.bf16.msra.mxu0 %v3846_v17 }
  0xbb   :  { %1473 = vmatprep.subr.bf16.mxu0 %v3854_v19 }
  0xbc   :  { %1554 = vmatpush1.bf16.msra.mxu1 %v3849_v22 }
  0xbd   :  { %1555 = vmatprep.subr.bf16.mxu1 %v3857_v24 }
  0xbe   :  { %1474 = vmatpush1.bf16.msra.mxu0 %v3852_v21  ;;  %v611_v21 = vrot.slane %v4589_v56, %v4605_v15 }
  0xbf   :  { %1475 = vmatprep.subr.bf16.mxu0 %v3860_v23  ;;  %v4611_v23 = vsub.s32 2, %v605_v52 }
  0xc0   :  { %1556 = vmatpush1.bf16.msra.mxu1 %v3855_v26  ;;  %v4613_v26 = vsub.s32 3, %v605_v52  ;;  %v3911_v52 = vld [vmem:[#allocation9 + $0x22c] ss:$16 sps:$4 sm:$0xff]  }
  0xc1   :  { %1557 = vmatprep.subr.bf16.mxu1 %v3863_v27 }
  0xc2   :  { %1476 = vmatpush1.bf16.msra.mxu0 %v3858_v25 }
  0xc3   :  { %1477 = vmatprep.subr.bf16.mxu0 %v3866_v29 }
  0xc4   :  { %1558 = vmatpush1.bf16.msra.mxu1 %v3861_v28 }
  0xc5   :  { %1559 = vmatprep.subr.bf16.mxu1 %v3869_v30 }
  0xc6   :  { %1478 = vmatpush1.bf16.msra.mxu0 %v3864_v31 }
  0xc7   :  { %1479 = vmatprep.subr.bf16.mxu0 %v3872_v34 }
  0xc8   :  { %1560 = vmatpush1.bf16.msra.mxu1 %v3867_v32  ;;  %v615_v32 = vrot.slane %v4589_v56, %v4611_v23 }
  0xc9   :  { %1561 = vmatprep.subr.bf16.mxu1 %v3875_v36 }
  0xca   :  { %1480 = vmatpush1.bf16.msra.mxu0 %v3870_v33 }
  0xcb   :  { %1481 = vmatprep.subr.bf16.mxu0 %v3878_v37 }
  0xcc   :  { %1562 = vmatpush1.bf16.msra.mxu1 %v3873_v35  ;;  %v619_v35 = vrot.slane %v4589_v56, %v4613_v26 }
  0xcd   :  { %1563 = vmatprep.subr.bf16.mxu1 %v3881_v38 }
  0xce   :  { %1482 = vmatpush1.bf16.msra.mxu0 %v3876_v39 }
  0xcf   :  { %1483 = vmatprep.subr.bf16.mxu0 %v3884_v42 }
  0xd0   :  { %1564 = vmatpush1.bf16.msra.mxu1 %v3879_v40 }
  0xd1   :  { %1565 = vmatprep.subr.bf16.mxu1 %v3887_v44  ;;  %v3903_v44 = vld [vmem:[#allocation9 + $0x208] ss:$16 sps:$4 sm:$0xff]  }
  0xd2   :  { %1484 = vmatpush1.bf16.msra.mxu0 %v3882_v41 }
  0xd3   :  { %1485 = vmatprep.subr.bf16.mxu0 %v3890_v45 }
  0xd4   :  { %1566 = vmatpush1.bf16.msra.mxu1 %v3885_v43  ;;  %v3900_v43 = vld [vmem:[#allocation9 + $0x200] ss:$16 sps:$4 sm:$0xff]  }
  0xd5   :  { %1567 = vmatprep.subr.bf16.mxu1 %v3893_v46 }
  0xd6   :  { %1486 = vmatpush1.bf16.msra.mxu0 %v3888_v48 }
  0xd7   :  { %1487 = vmatprep.subr.bf16.mxu0 %v3896_v50 }
  0xd8   :  { %1568 = vmatpush1.bf16.msra.mxu1 %v3891_v49 }
  0xd9   :  { %1569 = vmatprep.subr.bf16.mxu1 %v3899_v51  ;;  %v3908_v51 = vld [vmem:[#allocation9 + $0x224] ss:$16 sps:$4 sm:$0xff]  }
  0xda   :  { %1488 = vmatpush1.bf16.msra.mxu0 %v3894_v53 }
  0xdb   :  { %1498 = vmatprep.subr.bf16.mxu0 %v3902_v58 }
  0xdc   :  { %1570 = vmatpush1.bf16.msra.mxu1 %v3897_v54 }
  0xdd   :  { %1580 = vmatprep.subr.bf16.mxu1 %v3905_v59 }
 0x158   :  { %v221_v2 = vpop.f32.mrb[0].mxu0 }
 0x159   :  { %v223_v3 = vpop.f32.mrb[1].mxu0 }
 0x15a   :  { %v225_v4 = vpop.f32.mrb[2].mxu0  ;;  %v262_v6 = vpop.f32.mrb[0].mxu1 }
 0x15b   :  { %v226_v5 = vpop.f32.mrb[3].mxu0  ;;  %v264_v7 = vpop.f32.mrb[1].mxu1 }
 0x15c   :  { %v266_v8 = vpop.f32.mrb[2].mxu1 }
 0x15d   :  { %v267_v10 = vpop.f32.mrb[3].mxu1 }
 0x160   :  { %v303_v9 = vpop.f32.mrb[4].mxu0 }
 0x161   :  { %v305_v11 = vpop.f32.mrb[5].mxu0 }
 0x162   :  { %v307_v12 = vpop.f32.mrb[6].mxu0  ;;  %v344_v16 = vpop.f32.mrb[4].mxu1 }
 0x163   :  { %v308_v13 = vpop.f32.mrb[7].mxu0  ;;  %v346_v17 = vpop.f32.mrb[5].mxu1  ;;  %v3920_v12 = vld [vmem:[#allocation9 + $0x264] ss:$16 sps:$4 sm:$0xff]  }
 0x164   :  { %v348_v19 = vpop.f32.mrb[6].mxu1  ;;  %v3923_v13 = vld [vmem:[#allocation9 + $0x26c] ss:$16 sps:$4 sm:$0xff]  }
 0x165   :  { %v349_v22 = vpop.f32.mrb[7].mxu1  ;;  %v3926_v19 = vld [vmem:[#allocation9 + $0x284] ss:$16 sps:$4 sm:$0xff]  }
 0x166   :  { %v3932_v22 = vld [vmem:[#allocation9 + $0x2a4] ss:$16 sps:$4 sm:$0xff]  }
 0x168   :  { %v473_v20 = vpop.f32.mrb[8].mxu0 }
 0x169   :  { %v474_v24 = vadd.f32 %v473_v20, %v221_v2  ;;  %v475_v25 = vpop.f32.mrb[9].mxu0  ;;  %v3914_v2 = vld [vmem:[#allocation9 + $0x244] ss:$16 sps:$4 sm:$0xff]   ;;  %v3929_v20 = vld [vmem:[#allocation9 + $0x28c] ss:$16 sps:$4 sm:$0xff]  }
 0x16a   :  { %v476_v27 = vadd.f32 %v475_v25, %v223_v3  ;;  %v477_v28 = vpop.f32.mrb[10].mxu0  ;;  %v514_v34 = vpop.f32.mrb[8].mxu1  ;;  %v3917_v3 = vld [vmem:[#allocation9 + $0x24c] ss:$16 sps:$4 sm:$0xff]   ;;  %v3933_v25 = vld [vmem:[#allocation9 + $0x2a8] ss:$16 sps:$4 sm:$0xff]  }
 0x16b   :  { %v644_v29 = vadd.f32 %v607_v18, %v474_v24  ;;  %v478_v30 = vpop.f32.mrb[11].mxu0  ;;  %v515_v37 = vadd.f32 %v514_v34, %v262_v6  ;;  %v516_v38 = vpop.f32.mrb[9].mxu1  ;;  %v3935_v24 = vld [vmem:[#allocation9 + $0x2ac] ss:$16 sps:$4 sm:$0xff]   ;;  %v3945_v34 = vld [vmem:[#allocation9 + $0x2e8] ss:$16 sps:$4 sm:$0xff]  }
 0x16c   :  { %v645_v31 = vadd.f32 %v611_v21, %v476_v27  ;;  %v517_v39 = vadd.f32 %v516_v38, %v264_v7  ;;  %v518_v40 = vpop.f32.mrb[10].mxu1  ;;  %v3927_v21 = vld [vmem:[#allocation9 + $0x288] ss:$16 sps:$4 sm:$0xff]   ;;  %v3938_v27 = vld [vmem:[#allocation9 + $0x2c4] ss:$16 sps:$4 sm:$0xff]  }
 0x16d   :  { %v652_v33 = vmax.f32 %v644_v29, 0.0  ;;  %v4619_v45 = vadd.f32 %v615_v32, %v515_v37  ;;  %v519_v46 = vpop.f32.mrb[11].mxu1  ;;  %v3941_v28 = vld [vmem:[#allocation9 + $0x2cc] ss:$16 sps:$4 sm:$0xff]   ;;  %v3936_v29 = vld [vmem:[#allocation9 + $0x2c0] ss:$16 sps:$4 sm:$0xff]  }
 0x16e   :  { %v653_v36 = vmax.f32 %v645_v31, 0.0  ;;  %v647_v53 = vadd.f32 %v619_v35, %v517_v39  ;;  %v3939_v30 = vld [vmem:[#allocation9 + $0x2c8] ss:$16 sps:$4 sm:$0xff]   ;;  %v3944_v31 = vld [vmem:[#allocation9 + $0x2e4] ss:$16 sps:$4 sm:$0xff]  }
 0x16f   :  { %v660_v48 = vpack.c.bf16 %v652_v33, %v652_v33  ;;  %v3947_v32 = vld [vmem:[#allocation9 + $0x2ec] ss:$16 sps:$4 sm:$0xff]   ;;  %v3942_v33 = vld [vmem:[#allocation9 + $0x2e0] ss:$16 sps:$4 sm:$0xff]   ;;  %v3950_v35 = vld [vmem:[#allocation9 + $0x304] ss:$16 sps:$4 sm:$0xff]  }
 0x170   :  { %v661_v41 = vpack.c.bf16 %v653_v36, %v653_v36  ;;  %v555_v42 = vpop.f32.mrb[12].mxu0  ;;  %v655_v57 = vmax.f32 %v647_v53, 0.0  ;;  %v3953_v36 = vld [vmem:[#allocation9 + $0x30c] ss:$16 sps:$4 sm:$0xff]   ;;  %v3948_v37 = vld [vmem:[#allocation9 + $0x300] ss:$16 sps:$4 sm:$0xff]  }
 0x171   :  { %v556_v49 = vadd.f32 %v555_v42, %v303_v9  ;;  %v557_v50 = vpop.f32.mrb[13].mxu0  ;;  %v3915_v9 = vld [vmem:[#allocation9 + $0x248] ss:$16 sps:$4 sm:$0xff]   ;;  %v3956_v39 = vld [vmem:[#allocation9 + $0x324] ss:$16 sps:$4 sm:$0xff]  }
 0x172   :  { %v558_v54 = vadd.f32 %v557_v50, %v305_v11  ;;  %1489 = vmatprep.mubr.bf16.mxu0 %v661_v41  ;;  %1571 = vmatprep.mubr.bf16.mxu1 %v661_v41  ;;  %v559_v55 = vpop.f32.mrb[14].mxu0  ;;  %v663_v4 = vpack.c.bf16 %v655_v57, %v655_v57  ;;  %v596_v5 = vpop.f32.mrb[12].mxu1  ;;  %v3951_v38 = vld [vmem:[#allocation9 + $0x308] ss:$16 sps:$4 sm:$0xff]   ;;  %v3959_v40 = vld [vmem:[#allocation9 + $0x32c] ss:$16 sps:$4 sm:$0xff]  }
 0x173   :  { %v4622_v56 = vadd.f32 %v4592_v60, %v556_v49  ;;  %1490 = vmatmul.mubr.bf16.vlgmr.msra.gmra.mrb[16].mxu0 %v660_v48  ;;  %1572 = vmatmul.mubr.bf16.vlgmr.msra.gmra.mrb[16].mxu1 %v660_v48  ;;  %v560_v58 = vpop.f32.mrb[15].mxu0  ;;  %v597_v6 = vadd.f32 %v596_v5, %v344_v16  ;;  %v598_v60 = vpop.f32.mrb[13].mxu1  ;;  %v3918_v16 = vld [vmem:[#allocation9 + $0x260] ss:$16 sps:$4 sm:$0xff]   ;;  %v3957_v42 = vld [vmem:[#allocation9 + $0x328] ss:$16 sps:$4 sm:$0xff]  }
 0x174   :  { %v4625_v59 = vadd.f32 %v4595_v61, %v558_v54  ;;  %1499 = vmatpush1.bf16.msra.mxu0 %v3900_v43  ;;  %1581 = vmatpush1.bf16.msra.mxu1 %v3903_v44  ;;  %v599_v7 = vadd.f32 %v598_v60, %v346_v17  ;;  %v600_v8 = vpop.f32.mrb[14].mxu1  ;;  %v3912_v61 = vld [vmem:[#allocation9 + $0x240] ss:$16 sps:$4 sm:$0xff]   ;;  %v3921_v17 = vld [vmem:[#allocation9 + $0x268] ss:$16 sps:$4 sm:$0xff]  }
 0x175   :  { %1500 = vmatprep.subr.bf16.mxu0 %v3908_v51  ;;  %1582 = vmatprep.subr.bf16.mxu1 %v3911_v52  ;;  %v4628_v10 = vadd.f32 %v4598_v0, %v597_v6  ;;  %v601_v11 = vpop.f32.mrb[15].mxu1  ;;  %v3924_v0 = vld [vmem:[#allocation9 + $0x280] ss:$16 sps:$4 sm:$0xff]   ;;  %v3962_v43 = vld [vmem:[#allocation9 + $0x344] ss:$16 sps:$4 sm:$0xff]  }
 0x176   :  { %1530 = vmatprep.mubr.bf16.mxu0 %v663_v4  ;;  %1612 = vmatprep.mubr.bf16.mxu1 %v663_v4  ;;  %v4631_v18 = vadd.f32 %v4601_v1, %v599_v7  ;;  %v3930_v1 = vld [vmem:[#allocation9 + $0x2a0] ss:$16 sps:$4 sm:$0xff]   ;;  %v3965_v44 = vld [vmem:[#allocation9 + $0x34c] ss:$16 sps:$4 sm:$0xff]   ;;  %v3963_v48 = vld [vmem:[#allocation9 + $0x348] ss:$16 sps:$4 sm:$0xff]  }
 0x177   :  { %v3954_v41 = vld [vmem:[#allocation9 + $0x320] ss:$16 sps:$4 sm:$0xff]   ;;  %v3968_v49 = vld [vmem:[#allocation9 + $0x364] ss:$16 sps:$4 sm:$0xff]   ;;  %v3971_v50 = vld [vmem:[#allocation9 + $0x36c] ss:$16 sps:$4 sm:$0xff]  }
 0x178   :  { %1501 = vmatpush1.bf16.msra.mxu0 %v3906_v62  ;;  %1583 = vmatpush1.bf16.msra.mxu1 %v3909_v63  ;;  %v3960_v46 = vld [vmem:[#allocation9 + $0x340] ss:$16 sps:$4 sm:$0xff]   ;;  %v3969_v52 = vld [vmem:[#allocation9 + $0x368] ss:$16 sps:$4 sm:$0xff]   ;;  %v3974_v53 = vld [vmem:[#allocation9 + $0x384] ss:$16 sps:$4 sm:$0xff]  }
 0x179   :  { %1502 = vmatprep.subr.bf16.mxu0 %v3914_v2  ;;  %1584 = vmatprep.subr.bf16.mxu1 %v3917_v3  ;;  %v3966_v51 = vld [vmem:[#allocation9 + $0x360] ss:$16 sps:$4 sm:$0xff]   ;;  %v3977_v54 = vld [vmem:[#allocation9 + $0x38c] ss:$16 sps:$4 sm:$0xff]   ;;  %v3975_v57 = vld [vmem:[#allocation9 + $0x388] ss:$16 sps:$4 sm:$0xff]  }
 0x17a   :  { %v3972_v55 = vld [vmem:[#allocation9 + $0x380] ss:$16 sps:$4 sm:$0xff]   ;;  %v3980_v58 = vld [vmem:[#allocation9 + $0x3a4] ss:$16 sps:$4 sm:$0xff]   ;;  %v3983_v62 = vld [vmem:[#allocation9 + $0x3ac] ss:$16 sps:$4 sm:$0xff]  }
 0x17b   :  { %v3978_v63 = vld [vmem:[#allocation9 + $0x3a0] ss:$16 sps:$4 sm:$0xff]   ;;  %v3981_v2 = vld [vmem:[#allocation9 + $0x3a8] ss:$16 sps:$4 sm:$0xff]   ;;  %v3986_v3 = vld [vmem:[#allocation9 + $0x3c4] ss:$16 sps:$4 sm:$0xff]  }
 0x17c   :  { %1503 = vmatpush1.bf16.msra.mxu0 %v3912_v61  ;;  %1585 = vmatpush1.bf16.msra.mxu1 %v3915_v9  ;;  %v3989_v4 = vld [vmem:[#allocation9 + $0x3cc] ss:$16 sps:$4 sm:$0xff]   ;;  %v3984_v5 = vld [vmem:[#allocation9 + $0x3c0] ss:$16 sps:$4 sm:$0xff]   ;;  %v3987_v6 = vld [vmem:[#allocation9 + $0x3c8] ss:$16 sps:$4 sm:$0xff]  }
 0x17d   :  { %1504 = vmatprep.subr.bf16.mxu0 %v3920_v12  ;;  %1586 = vmatprep.subr.bf16.mxu1 %v3923_v13  ;;  %v3992_v60 = vld [vmem:[#allocation9 + $0x3e4] ss:$16 sps:$4 sm:$0xff]   ;;  %v3995_v7 = vld [vmem:[#allocation9 + $0x3ec] ss:$16 sps:$4 sm:$0xff]   ;;  %v3990_v8 = vld [vmem:[#allocation9 + $0x3e0] ss:$16 sps:$4 sm:$0xff]  }
 0x17e   :  { %v3993_v61 = vld [vmem:[#allocation9 + $0x3e8] ss:$16 sps:$4 sm:$0xff]   ;;  %v654_v9 = vmax.f32 %v4619_v45, 0.0  ;;  %v3998_v11 = vld [vmem:[#allocation9 + $0x404] ss:$16 sps:$4 sm:$0xff]   ;;  %v657_v13 = vmax.f32 %v4625_v59, 0.0 }
 0x17f   :  { %v4001_v12 = vld [vmem:[#allocation9 + $0x40c] ss:$16 sps:$4 sm:$0xff]   ;;  %v4002_v45 = vld [vmem:[#allocation9 + $0x420] ss:$16 sps:$4 sm:$0xff]  }
 0x180   :  { %1505 = vmatpush1.bf16.msra.mxu0 %v3918_v16  ;;  %1587 = vmatpush1.bf16.msra.mxu1 %v3921_v17  ;;  %v3996_v16 = vld [vmem:[#allocation9 + $0x400] ss:$16 sps:$4 sm:$0xff]   ;;  %v662_v17 = vpack.c.bf16 %v654_v9, %v654_v9  ;;  %v4013_v59 = vld [vmem:[#allocation9 + $0x44c] ss:$16 sps:$4 sm:$0xff]   ;;  %v4076_v9 = vld [vmem:[#allocation9 + $0x5a4] ss:$16 sps:$4 sm:$0xff]  }
 0x181   :  { %1506 = vmatprep.subr.bf16.mxu0 %v3926_v19  ;;  %1588 = vmatprep.subr.bf16.mxu1 %v3929_v20  ;;  %v3999_v19 = vld [vmem:[#allocation9 + $0x408] ss:$16 sps:$4 sm:$0xff]   ;;  %v665_v20 = vpack.c.bf16 %v657_v13, %v657_v13 }
 0x182   :  { %v4077_v13 = vld [vmem:[#allocation9 + $0x5a8] ss:$16 sps:$4 sm:$0xff]  }
 0x184   :  { %1507 = vmatpush1.bf16.msra.mxu0 %v3924_v0  ;;  %1589 = vmatpush1.bf16.msra.mxu1 %v3927_v21  ;;  %v4004_v0 = vld [vmem:[#allocation9 + $0x424] ss:$16 sps:$4 sm:$0xff]   ;;  %v4007_v21 = vld [vmem:[#allocation9 + $0x42c] ss:$16 sps:$4 sm:$0xff]  }
 0x185   :  { %1508 = vmatprep.subr.bf16.mxu0 %v3932_v22  ;;  %1590 = vmatprep.subr.bf16.mxu1 %v3935_v24  ;;  %v4005_v22 = vld [vmem:[#allocation9 + $0x428] ss:$16 sps:$4 sm:$0xff]   ;;  %v4010_v24 = vld [vmem:[#allocation9 + $0x444] ss:$16 sps:$4 sm:$0xff]  }
 0x188   :  { %1509 = vmatpush1.bf16.msra.mxu0 %v3930_v1  ;;  %1591 = vmatpush1.bf16.msra.mxu1 %v3933_v25  ;;  %v4008_v1 = vld [vmem:[#allocation9 + $0x440] ss:$16 sps:$4 sm:$0xff]   ;;  %v4011_v25 = vld [vmem:[#allocation9 + $0x448] ss:$16 sps:$4 sm:$0xff]  }
 0x189   :  { %1510 = vmatprep.subr.bf16.mxu0 %v3938_v27  ;;  %1592 = vmatprep.subr.bf16.mxu1 %v3941_v28  ;;  %v4016_v27 = vld [vmem:[#allocation9 + $0x464] ss:$16 sps:$4 sm:$0xff]   ;;  %v4019_v28 = vld [vmem:[#allocation9 + $0x46c] ss:$16 sps:$4 sm:$0xff]  }
 0x18c   :  { %1511 = vmatpush1.bf16.msra.mxu0 %v3936_v29  ;;  %1593 = vmatpush1.bf16.msra.mxu1 %v3939_v30  ;;  %v4014_v29 = vld [vmem:[#allocation9 + $0x460] ss:$16 sps:$4 sm:$0xff]   ;;  %v4017_v30 = vld [vmem:[#allocation9 + $0x468] ss:$16 sps:$4 sm:$0xff]  }
 0x18d   :  { %1512 = vmatprep.subr.bf16.mxu0 %v3944_v31  ;;  %1594 = vmatprep.subr.bf16.mxu1 %v3947_v32  ;;  %v4022_v31 = vld [vmem:[#allocation9 + $0x484] ss:$16 sps:$4 sm:$0xff]   ;;  %v4025_v32 = vld [vmem:[#allocation9 + $0x48c] ss:$16 sps:$4 sm:$0xff]  }
 0x190   :  { %1513 = vmatpush1.bf16.msra.mxu0 %v3942_v33  ;;  %1595 = vmatpush1.bf16.msra.mxu1 %v3945_v34  ;;  %v4020_v33 = vld [vmem:[#allocation9 + $0x480] ss:$16 sps:$4 sm:$0xff]   ;;  %v4023_v34 = vld [vmem:[#allocation9 + $0x488] ss:$16 sps:$4 sm:$0xff]  }
 0x191   :  { %1514 = vmatprep.subr.bf16.mxu0 %v3950_v35  ;;  %1596 = vmatprep.subr.bf16.mxu1 %v3953_v36  ;;  %v4028_v35 = vld [vmem:[#allocation9 + $0x4a4] ss:$16 sps:$4 sm:$0xff]   ;;  %v4031_v36 = vld [vmem:[#allocation9 + $0x4ac] ss:$16 sps:$4 sm:$0xff]  }
 0x194   :  { %1515 = vmatpush1.bf16.msra.mxu0 %v3948_v37  ;;  %1597 = vmatpush1.bf16.msra.mxu1 %v3951_v38  ;;  %v4026_v37 = vld [vmem:[#allocation9 + $0x4a0] ss:$16 sps:$4 sm:$0xff]   ;;  %v4029_v38 = vld [vmem:[#allocation9 + $0x4a8] ss:$16 sps:$4 sm:$0xff]  }
 0x195   :  { %1516 = vmatprep.subr.bf16.mxu0 %v3956_v39  ;;  %1598 = vmatprep.subr.bf16.mxu1 %v3959_v40  ;;  %v4034_v39 = vld [vmem:[#allocation9 + $0x4c4] ss:$16 sps:$4 sm:$0xff]   ;;  %v4037_v40 = vld [vmem:[#allocation9 + $0x4cc] ss:$16 sps:$4 sm:$0xff]  }
 0x198   :  { %1517 = vmatpush1.bf16.msra.mxu0 %v3954_v41  ;;  %1599 = vmatpush1.bf16.msra.mxu1 %v3957_v42  ;;  %v4032_v41 = vld [vmem:[#allocation9 + $0x4c0] ss:$16 sps:$4 sm:$0xff]   ;;  %v4035_v42 = vld [vmem:[#allocation9 + $0x4c8] ss:$16 sps:$4 sm:$0xff]  }
 0x199   :  { %1518 = vmatprep.subr.bf16.mxu0 %v3962_v43  ;;  %1600 = vmatprep.subr.bf16.mxu1 %v3965_v44  ;;  %v4040_v43 = vld [vmem:[#allocation9 + $0x4e4] ss:$16 sps:$4 sm:$0xff]   ;;  %v4043_v44 = vld [vmem:[#allocation9 + $0x4ec] ss:$16 sps:$4 sm:$0xff]  }
 0x19c   :  { %1519 = vmatpush1.bf16.msra.mxu0 %v3960_v46  ;;  %1601 = vmatpush1.bf16.msra.mxu1 %v3963_v48  ;;  %v4038_v46 = vld [vmem:[#allocation9 + $0x4e0] ss:$16 sps:$4 sm:$0xff]   ;;  %v4041_v48 = vld [vmem:[#allocation9 + $0x4e8] ss:$16 sps:$4 sm:$0xff]  }
 0x19d   :  { %1520 = vmatprep.subr.bf16.mxu0 %v3968_v49  ;;  %1602 = vmatprep.subr.bf16.mxu1 %v3971_v50  ;;  %v4046_v49 = vld [vmem:[#allocation9 + $0x504] ss:$16 sps:$4 sm:$0xff]   ;;  %v4049_v50 = vld [vmem:[#allocation9 + $0x50c] ss:$16 sps:$4 sm:$0xff]  }
 0x1a0   :  { %1521 = vmatpush1.bf16.msra.mxu0 %v3966_v51  ;;  %1603 = vmatpush1.bf16.msra.mxu1 %v3969_v52  ;;  %v4044_v51 = vld [vmem:[#allocation9 + $0x500] ss:$16 sps:$4 sm:$0xff]   ;;  %v4047_v52 = vld [vmem:[#allocation9 + $0x508] ss:$16 sps:$4 sm:$0xff]  }
 0x1a1   :  { %1522 = vmatprep.subr.bf16.mxu0 %v3974_v53  ;;  %1604 = vmatprep.subr.bf16.mxu1 %v3977_v54  ;;  %v4052_v53 = vld [vmem:[#allocation9 + $0x524] ss:$16 sps:$4 sm:$0xff]   ;;  %v4055_v54 = vld [vmem:[#allocation9 + $0x52c] ss:$16 sps:$4 sm:$0xff]  }
 0x1a4   :  { %1523 = vmatpush1.bf16.msra.mxu0 %v3972_v55  ;;  %1605 = vmatpush1.bf16.msra.mxu1 %v3975_v57  ;;  %v4050_v55 = vld [vmem:[#allocation9 + $0x520] ss:$16 sps:$4 sm:$0xff]   ;;  %v4053_v57 = vld [vmem:[#allocation9 + $0x528] ss:$16 sps:$4 sm:$0xff]  }
 0x1a5   :  { %1524 = vmatprep.subr.bf16.mxu0 %v3980_v58  ;;  %1606 = vmatprep.subr.bf16.mxu1 %v3983_v62  ;;  %v4058_v58 = vld [vmem:[#allocation9 + $0x544] ss:$16 sps:$4 sm:$0xff]   ;;  %v4061_v62 = vld [vmem:[#allocation9 + $0x54c] ss:$16 sps:$4 sm:$0xff]  }
 0x1a8   :  { %1525 = vmatpush1.bf16.msra.mxu0 %v3978_v63  ;;  %1607 = vmatpush1.bf16.msra.mxu1 %v3981_v2  ;;  %v4056_v63 = vld [vmem:[#allocation9 + $0x540] ss:$16 sps:$4 sm:$0xff]   ;;  %v4059_v2 = vld [vmem:[#allocation9 + $0x548] ss:$16 sps:$4 sm:$0xff]  }
 0x1a9   :  { %1526 = vmatprep.subr.bf16.mxu0 %v3986_v3  ;;  %1608 = vmatprep.subr.bf16.mxu1 %v3989_v4  ;;  %v4064_v3 = vld [vmem:[#allocation9 + $0x564] ss:$16 sps:$4 sm:$0xff]   ;;  %v4067_v4 = vld [vmem:[#allocation9 + $0x56c] ss:$16 sps:$4 sm:$0xff]  }
 0x1ac   :  { %1527 = vmatpush1.bf16.msra.mxu0 %v3984_v5  ;;  %1609 = vmatpush1.bf16.msra.mxu1 %v3987_v6  ;;  %v4062_v5 = vld [vmem:[#allocation9 + $0x560] ss:$16 sps:$4 sm:$0xff]   ;;  %v4065_v6 = vld [vmem:[#allocation9 + $0x568] ss:$16 sps:$4 sm:$0xff]  }
 0x1ad   :  { %1528 = vmatprep.subr.bf16.mxu0 %v3992_v60  ;;  %1610 = vmatprep.subr.bf16.mxu1 %v3995_v7  ;;  %v4070_v60 = vld [vmem:[#allocation9 + $0x584] ss:$16 sps:$4 sm:$0xff]   ;;  %v4073_v7 = vld [vmem:[#allocation9 + $0x58c] ss:$16 sps:$4 sm:$0xff]  }
 0x1b0   :  { %1529 = vmatpush1.bf16.msra.mxu0 %v3990_v8  ;;  %1611 = vmatpush1.bf16.msra.mxu1 %v3993_v61  ;;  %v4068_v8 = vld [vmem:[#allocation9 + $0x580] ss:$16 sps:$4 sm:$0xff]   ;;  %v4071_v61 = vld [vmem:[#allocation9 + $0x588] ss:$16 sps:$4 sm:$0xff]  }
 0x1b1   :  { %2419 = vmatprep.subr.bf16.mxu0 %v3998_v11  ;;  %2501 = vmatprep.subr.bf16.mxu1 %v4001_v12  ;;  %v4079_v11 = vld [vmem:[#allocation9 + $0x5ac] ss:$16 sps:$4 sm:$0xff]   ;;  %v4074_v12 = vld [vmem:[#allocation9 + $0x5a0] ss:$16 sps:$4 sm:$0xff]  }
 0x1b3   :  { %1531 = vmatmul.mubr.bf16.vlgmr.msra.gmra.mrb[16].mxu0 %v662_v17  ;;  %1613 = vmatmul.mubr.bf16.vlgmr.msra.gmra.mrb[16].mxu1 %v662_v17  ;;  %v4085_v17 = vld [vmem:[#allocation9 + $0x5cc] ss:$16 sps:$4 sm:$0xff]  }
 0x1b4   :  { %2420 = vmatpush1.bf16.msra.mxu0 %v3996_v16  ;;  %2451 = vmatprep.mubr.bf16.mxu0 %v665_v20  ;;  %v4082_v16 = vld [vmem:[#allocation9 + $0x5c4] ss:$16 sps:$4 sm:$0xff]  }
 0x1b5   :  { %2502 = vmatpush1.bf16.msra.mxu1 %v3999_v19  ;;  %2533 = vmatprep.mubr.bf16.mxu1 %v665_v20  ;;  %v4080_v19 = vld [vmem:[#allocation9 + $0x5c0] ss:$16 sps:$4 sm:$0xff]   ;;  %v4083_v20 = vld [vmem:[#allocation9 + $0x5c8] ss:$16 sps:$4 sm:$0xff]  }
 0x1b6   :  { %2421 = vmatprep.subr.bf16.mxu0 %v4004_v0  ;;  %2503 = vmatprep.subr.bf16.mxu1 %v4007_v21  ;;  %v4088_v0 = vld [vmem:[#allocation9 + $0x5e4] ss:$16 sps:$4 sm:$0xff]   ;;  %v4091_v21 = vld [vmem:[#allocation9 + $0x5ec] ss:$16 sps:$4 sm:$0xff]  }
 0x1b8   :  { %2422 = vmatpush1.bf16.msra.mxu0 %v4002_v45  ;;  %v4086_v45 = vld [vmem:[#allocation9 + $0x5e0] ss:$16 sps:$4 sm:$0xff]  }
 0x1b9   :  { %2504 = vmatpush1.bf16.msra.mxu1 %v4005_v22  ;;  %2423 = vmatprep.subr.bf16.mxu0 %v4010_v24  ;;  %v656_v22 = vmax.f32 %v4622_v56, 0.0  ;;  %v4089_v24 = vld [vmem:[#allocation9 + $0x5e8] ss:$16 sps:$4 sm:$0xff]   ;;  %v4098_v56 = vld [vmem:[#allocation9 + $0x620] ss:$16 sps:$4 sm:$0xff]  }
 0x1ba   :  { %2505 = vmatprep.subr.bf16.mxu1 %v4013_v59  ;;  %v4094_v59 = vld [vmem:[#allocation9 + $0x604] ss:$16 sps:$4 sm:$0xff]  }
 0x1bc   :  { %2424 = vmatpush1.bf16.msra.mxu0 %v4008_v1  ;;  %v4097_v1 = vld [vmem:[#allocation9 + $0x60c] ss:$16 sps:$4 sm:$0xff]  }
 0x1bd   :  { %2506 = vmatpush1.bf16.msra.mxu1 %v4011_v25  ;;  %2425 = vmatprep.subr.bf16.mxu0 %v4016_v27  ;;  %v659_v25 = vmax.f32 %v4631_v18, 0.0  ;;  %v4092_v27 = vld [vmem:[#allocation9 + $0x600] ss:$16 sps:$4 sm:$0xff]   ;;  %v4109_v18 = vld [vmem:[#allocation9 + $0x64c] ss:$16 sps:$4 sm:$0xff]  }
 0x1be   :  { %2507 = vmatprep.subr.bf16.mxu1 %v4019_v28  ;;  %v664_v28 = vpack.c.bf16 %v656_v22, %v656_v22  ;;  %v4175_v22 = vld [vmem:[#allocation9 + $0x7ac] ss:$16 sps:$4 sm:$0xff]  }
 0x1c0   :  { %2426 = vmatpush1.bf16.msra.mxu0 %v4014_v29  ;;  %v4095_v29 = vld [vmem:[#allocation9 + $0x608] ss:$16 sps:$4 sm:$0xff]  }
 0x1c1   :  { %2508 = vmatpush1.bf16.msra.mxu1 %v4017_v30  ;;  %2427 = vmatprep.subr.bf16.mxu0 %v4022_v31  ;;  %v4100_v30 = vld [vmem:[#allocation9 + $0x624] ss:$16 sps:$4 sm:$0xff]   ;;  %v667_v31 = vpack.c.bf16 %v659_v25, %v659_v25  ;;  %v4181_v25 = vld [vmem:[#allocation9 + $0x7cc] ss:$16 sps:$4 sm:$0xff]  }
 0x1c2   :  { %2509 = vmatprep.subr.bf16.mxu1 %v4025_v32  ;;  %v4103_v32 = vld [vmem:[#allocation9 + $0x62c] ss:$16 sps:$4 sm:$0xff]  }
 0x1c4   :  { %2428 = vmatpush1.bf16.msra.mxu0 %v4020_v33  ;;  %v4101_v33 = vld [vmem:[#allocation9 + $0x628] ss:$16 sps:$4 sm:$0xff]  }
 0x1c5   :  { %2510 = vmatpush1.bf16.msra.mxu1 %v4023_v34  ;;  %2429 = vmatprep.subr.bf16.mxu0 %v4028_v35  ;;  %v4106_v34 = vld [vmem:[#allocation9 + $0x644] ss:$16 sps:$4 sm:$0xff]   ;;  %v4104_v35 = vld [vmem:[#allocation9 + $0x640] ss:$16 sps:$4 sm:$0xff]  }
 0x1c6   :  { %2511 = vmatprep.subr.bf16.mxu1 %v4031_v36  ;;  %v4107_v36 = vld [vmem:[#allocation9 + $0x648] ss:$16 sps:$4 sm:$0xff]  }
 0x1c8   :  { %2430 = vmatpush1.bf16.msra.mxu0 %v4026_v37  ;;  %v4112_v37 = vld [vmem:[#allocation9 + $0x664] ss:$16 sps:$4 sm:$0xff]  }
 0x1c9   :  { %2512 = vmatpush1.bf16.msra.mxu1 %v4029_v38  ;;  %2431 = vmatprep.subr.bf16.mxu0 %v4034_v39  ;;  %v4115_v38 = vld [vmem:[#allocation9 + $0x66c] ss:$16 sps:$4 sm:$0xff]   ;;  %v4110_v39 = vld [vmem:[#allocation9 + $0x660] ss:$16 sps:$4 sm:$0xff]  }
 0x1ca   :  { %2513 = vmatprep.subr.bf16.mxu1 %v4037_v40  ;;  %v4113_v40 = vld [vmem:[#allocation9 + $0x668] ss:$16 sps:$4 sm:$0xff]  }
 0x1cc   :  { %2432 = vmatpush1.bf16.msra.mxu0 %v4032_v41  ;;  %v4118_v41 = vld [vmem:[#allocation9 + $0x684] ss:$16 sps:$4 sm:$0xff]  }
 0x1cd   :  { %2514 = vmatpush1.bf16.msra.mxu1 %v4035_v42  ;;  %2433 = vmatprep.subr.bf16.mxu0 %v4040_v43  ;;  %v4121_v42 = vld [vmem:[#allocation9 + $0x68c] ss:$16 sps:$4 sm:$0xff]   ;;  %v4116_v43 = vld [vmem:[#allocation9 + $0x680] ss:$16 sps:$4 sm:$0xff]  }
 0x1ce   :  { %2515 = vmatprep.subr.bf16.mxu1 %v4043_v44  ;;  %v4119_v44 = vld [vmem:[#allocation9 + $0x688] ss:$16 sps:$4 sm:$0xff]  }
 0x1d0   :  { %2434 = vmatpush1.bf16.msra.mxu0 %v4038_v46  ;;  %v4124_v46 = vld [vmem:[#allocation9 + $0x6a4] ss:$16 sps:$4 sm:$0xff]  }
 0x1d1   :  { %2516 = vmatpush1.bf16.msra.mxu1 %v4041_v48  ;;  %2435 = vmatprep.subr.bf16.mxu0 %v4046_v49  ;;  %v4127_v48 = vld [vmem:[#allocation9 + $0x6ac] ss:$16 sps:$4 sm:$0xff]   ;;  %v4122_v49 = vld [vmem:[#allocation9 + $0x6a0] ss:$16 sps:$4 sm:$0xff]  }
 0x1d2   :  { %2517 = vmatprep.subr.bf16.mxu1 %v4049_v50  ;;  %v4125_v50 = vld [vmem:[#allocation9 + $0x6a8] ss:$16 sps:$4 sm:$0xff]  }
 0x1d4   :  { %2436 = vmatpush1.bf16.msra.mxu0 %v4044_v51  ;;  %v4130_v51 = vld [vmem:[#allocation9 + $0x6c4] ss:$16 sps:$4 sm:$0xff]  }
 0x1d5   :  { %2518 = vmatpush1.bf16.msra.mxu1 %v4047_v52  ;;  %2437 = vmatprep.subr.bf16.mxu0 %v4052_v53  ;;  %v4133_v52 = vld [vmem:[#allocation9 + $0x6cc] ss:$16 sps:$4 sm:$0xff]   ;;  %v4128_v53 = vld [vmem:[#allocation9 + $0x6c0] ss:$16 sps:$4 sm:$0xff]  }
 0x1d6   :  { %2519 = vmatprep.subr.bf16.mxu1 %v4055_v54  ;;  %v4131_v54 = vld [vmem:[#allocation9 + $0x6c8] ss:$16 sps:$4 sm:$0xff]  }
 0x1d8   :  { %2438 = vmatpush1.bf16.msra.mxu0 %v4050_v55  ;;  %v4136_v55 = vld [vmem:[#allocation9 + $0x6e4] ss:$16 sps:$4 sm:$0xff]  }
 0x1d9   :  { %2520 = vmatpush1.bf16.msra.mxu1 %v4053_v57  ;;  %2439 = vmatprep.subr.bf16.mxu0 %v4058_v58  ;;  %v4139_v57 = vld [vmem:[#allocation9 + $0x6ec] ss:$16 sps:$4 sm:$0xff]   ;;  %v4134_v58 = vld [vmem:[#allocation9 + $0x6e0] ss:$16 sps:$4 sm:$0xff]  }
 0x1da   :  { %2521 = vmatprep.subr.bf16.mxu1 %v4061_v62  ;;  %v4137_v62 = vld [vmem:[#allocation9 + $0x6e8] ss:$16 sps:$4 sm:$0xff]  }
 0x1dc   :  { %2440 = vmatpush1.bf16.msra.mxu0 %v4056_v63  ;;  %v4142_v63 = vld [vmem:[#allocation9 + $0x704] ss:$16 sps:$4 sm:$0xff]  }
 0x1dd   :  { %2522 = vmatpush1.bf16.msra.mxu1 %v4059_v2  ;;  %2441 = vmatprep.subr.bf16.mxu0 %v4064_v3  ;;  %v4145_v2 = vld [vmem:[#allocation9 + $0x70c] ss:$16 sps:$4 sm:$0xff]   ;;  %v4140_v3 = vld [vmem:[#allocation9 + $0x700] ss:$16 sps:$4 sm:$0xff]  }
 0x1de   :  { %2523 = vmatprep.subr.bf16.mxu1 %v4067_v4  ;;  %v4143_v4 = vld [vmem:[#allocation9 + $0x708] ss:$16 sps:$4 sm:$0xff]  }
 0x1e0   :  { %2442 = vmatpush1.bf16.msra.mxu0 %v4062_v5  ;;  %v4148_v5 = vld [vmem:[#allocation9 + $0x724] ss:$16 sps:$4 sm:$0xff]  }
 0x1e1   :  { %2524 = vmatpush1.bf16.msra.mxu1 %v4065_v6  ;;  %2443 = vmatprep.subr.bf16.mxu0 %v4070_v60  ;;  %v4151_v6 = vld [vmem:[#allocation9 + $0x72c] ss:$16 sps:$4 sm:$0xff]   ;;  %v4146_v60 = vld [vmem:[#allocation9 + $0x720] ss:$16 sps:$4 sm:$0xff]  }
 0x1e2   :  { %2525 = vmatprep.subr.bf16.mxu1 %v4073_v7  ;;  %v4149_v7 = vld [vmem:[#allocation9 + $0x728] ss:$16 sps:$4 sm:$0xff]  }
 0x1e4   :  { %2444 = vmatpush1.bf16.msra.mxu0 %v4068_v8  ;;  %v4154_v8 = vld [vmem:[#allocation9 + $0x744] ss:$16 sps:$4 sm:$0xff]  }
 0x1e5   :  { %2526 = vmatpush1.bf16.msra.mxu1 %v4071_v61  ;;  %2445 = vmatprep.subr.bf16.mxu0 %v4076_v9  ;;  %v4157_v61 = vld [vmem:[#allocation9 + $0x74c] ss:$16 sps:$4 sm:$0xff]   ;;  %v4152_v9 = vld [vmem:[#allocation9 + $0x740] ss:$16 sps:$4 sm:$0xff]  }
 0x1e6   :  { %2527 = vmatprep.subr.bf16.mxu1 %v4079_v11  ;;  %v4155_v11 = vld [vmem:[#allocation9 + $0x748] ss:$16 sps:$4 sm:$0xff]  }
 0x1e8   :  { %2446 = vmatpush1.bf16.msra.mxu0 %v4074_v12  ;;  %v4160_v12 = vld [vmem:[#allocation9 + $0x764] ss:$16 sps:$4 sm:$0xff]  }
 0x1e9   :  { %2528 = vmatpush1.bf16.msra.mxu1 %v4077_v13  ;;  %2447 = vmatprep.subr.bf16.mxu0 %v4082_v16  ;;  %v4163_v13 = vld [vmem:[#allocation9 + $0x76c] ss:$16 sps:$4 sm:$0xff]   ;;  %v4158_v16 = vld [vmem:[#allocation9 + $0x760] ss:$16 sps:$4 sm:$0xff]  }
 0x1ea   :  { %2529 = vmatprep.subr.bf16.mxu1 %v4085_v17  ;;  %v4161_v17 = vld [vmem:[#allocation9 + $0x768] ss:$16 sps:$4 sm:$0xff]  }
 0x1ec   :  { %2448 = vmatpush1.bf16.msra.mxu0 %v4080_v19  ;;  %v4166_v19 = vld [vmem:[#allocation9 + $0x784] ss:$16 sps:$4 sm:$0xff]  }
 0x1ed   :  { %2530 = vmatpush1.bf16.msra.mxu1 %v4083_v20  ;;  %2449 = vmatprep.subr.bf16.mxu0 %v4088_v0  ;;  %v4169_v20 = vld [vmem:[#allocation9 + $0x78c] ss:$16 sps:$4 sm:$0xff]   ;;  %v4164_v0 = vld [vmem:[#allocation9 + $0x780] ss:$16 sps:$4 sm:$0xff]  }
 0x1ee   :  { %2531 = vmatprep.subr.bf16.mxu1 %v4091_v21  ;;  %v4167_v21 = vld [vmem:[#allocation9 + $0x788] ss:$16 sps:$4 sm:$0xff]  }
 0x1f0   :  { %2450 = vmatpush1.bf16.msra.mxu0 %v4086_v45  ;;  %v4172_v45 = vld [vmem:[#allocation9 + $0x7a4] ss:$16 sps:$4 sm:$0xff]  }
 0x1f1   :  { %2532 = vmatpush1.bf16.msra.mxu1 %v4089_v24  ;;  %2460 = vmatprep.subr.bf16.mxu0 %v4094_v59  ;;  %v4170_v24 = vld [vmem:[#allocation9 + $0x7a0] ss:$16 sps:$4 sm:$0xff]   ;;  %v4173_v59 = vld [vmem:[#allocation9 + $0x7a8] ss:$16 sps:$4 sm:$0xff]  }
 0x1f2   :  { %2542 = vmatprep.subr.bf16.mxu1 %v4097_v1  ;;  %v4178_v1 = vld [vmem:[#allocation9 + $0x7c4] ss:$16 sps:$4 sm:$0xff]  }
 0x1f3   :  { %2452 = vmatmul.mubr.bf16.vlgmr.msra.gmra.mrb[20].mxu0 %v664_v28 }
 0x1f4   :  { %2534 = vmatmul.mubr.bf16.vlgmr.msra.gmra.mrb[20].mxu1 %v664_v28  ;;  %2461 = vmatpush1.bf16.msra.mxu0 %v4092_v27  ;;  %v4176_v27 = vld [vmem:[#allocation9 + $0x7c0] ss:$16 sps:$4 sm:$0xff]   ;;  %v4179_v28 = vld [vmem:[#allocation9 + $0x7c8] ss:$16 sps:$4 sm:$0xff]  }
 0x1f5   :  { %2492 = vmatprep.mubr.bf16.mxu0 %v667_v31  ;;  %2543 = vmatpush1.bf16.msra.mxu1 %v4095_v29  ;;  %v4184_v29 = vld [vmem:[#allocation9 + $0x7e4] ss:$16 sps:$4 sm:$0xff]  }
 0x1f6   :  { %2574 = vmatprep.mubr.bf16.mxu1 %v667_v31  ;;  %2462 = vmatprep.subr.bf16.mxu0 %v4100_v30  ;;  %v4187_v30 = vld [vmem:[#allocation9 + $0x7ec] ss:$16 sps:$4 sm:$0xff]   ;;  %v4182_v31 = vld [vmem:[#allocation9 + $0x7e0] ss:$16 sps:$4 sm:$0xff]  }
 0x1f7   :  { %2544 = vmatprep.subr.bf16.mxu1 %v4103_v32  ;;  %v658_v32 = vmax.f32 %v4628_v10, 0.0  ;;  %v4195_v10 = vld [vmem:[#allocation10 + $0x188] sm:$0xff]  }
 0x1f8   :  { %2463 = vmatpush1.bf16.msra.mxu0 %v4098_v56  ;;  %v4185_v56 = vld [vmem:[#allocation9 + $0x7e8] ss:$16 sps:$4 sm:$0xff]  }
 0x1f9   :  { %2545 = vmatpush1.bf16.msra.mxu1 %v4101_v33  ;;  %2464 = vmatprep.subr.bf16.mxu0 %v4106_v34  ;;  %v4188_v33 = vld [vmem:[#allocation10 + $0x140] sm:$0xff]  }
 0x1fa   :  { %2546 = vmatprep.subr.bf16.mxu1 %v4109_v18  ;;  %v4189_v34 = vld [vmem:[#allocation10 + $0x1c0] sm:$0xff]  }
 0x1fb   :  { %v4190_v18 = vld [vmem:[#allocation10 + $0x100] sm:$0xff]  }
 0x1fc   :  { %2465 = vmatpush1.bf16.msra.mxu0 %v4104_v35  ;;  %v666_v35 = vpack.c.bf16 %v658_v32, %v658_v32 }
 0x1fd   :  { %2547 = vmatpush1.bf16.msra.mxu1 %v4107_v36  ;;  %2466 = vmatprep.subr.bf16.mxu0 %v4112_v37  ;;  %v4191_v36 = vld [vmem:[#allocation10 + $0x180] sm:$0xff]   ;;  %v4192_v37 = vld [vmem:[#allocation10 + $0x148] sm:$0xff]  }
 0x1fe   :  { %2548 = vmatprep.subr.bf16.mxu1 %v4115_v38  ;;  %v4193_v38 = vld [vmem:[#allocation10 + $0x1c8] sm:$0xff]  }
 0x200   :  { %2467 = vmatpush1.bf16.msra.mxu0 %v4110_v39  ;;  %v4194_v39 = vld [vmem:[#allocation10 + $0x108] sm:$0xff]  }
 0x201   :  { %2549 = vmatpush1.bf16.msra.mxu1 %v4113_v40  ;;  %2468 = vmatprep.subr.bf16.mxu0 %v4118_v41  ;;  %v4196_v40 = vld [vmem:[#allocation10 + $0x150] sm:$0xff]  }
 0x202   :  { %2550 = vmatprep.subr.bf16.mxu1 %v4121_v42  ;;  %v4197_v41 = vld [vmem:[#allocation10 + $0x1d0] sm:$0xff]  }
 0x203   :  { %v4198_v42 = vld [vmem:[#allocation10 + $0x110] sm:$0xff]  }
 0x204   :  { %2469 = vmatpush1.bf16.msra.mxu0 %v4116_v43  ;;  %v4199_v43 = vld [vmem:[#allocation10 + $0x190] sm:$0xff]  }
 0x205   :  { %2551 = vmatpush1.bf16.msra.mxu1 %v4119_v44  ;;  %2470 = vmatprep.subr.bf16.mxu0 %v4124_v46  ;;  %v4200_v44 = vld [vmem:[#allocation10 + $0x158] sm:$0xff]  }
 0x206   :  { %2552 = vmatprep.subr.bf16.mxu1 %v4127_v48  ;;  %v4201_v46 = vld [vmem:[#allocation10 + $0x1d8] sm:$0xff]  }
 0x207   :  { %v4202_v48 = vld [vmem:[#allocation10 + $0x118] sm:$0xff]  }
 0x208   :  { %2471 = vmatpush1.bf16.msra.mxu0 %v4122_v49  ;;  %v4203_v49 = vld [vmem:[#allocation10 + $0x198] sm:$0xff]  }
 0x209   :  { %2553 = vmatpush1.bf16.msra.mxu1 %v4125_v50  ;;  %2472 = vmatprep.subr.bf16.mxu0 %v4130_v51  ;;  %v4204_v50 = vld [vmem:[#allocation10 + $0x160] sm:$0xff]  }
 0x20a   :  { %2554 = vmatprep.subr.bf16.mxu1 %v4133_v52  ;;  %v4205_v51 = vld [vmem:[#allocation10 + $0x1e0] sm:$0xff]  }
 0x20b   :  { %v4206_v52 = vld [vmem:[#allocation10 + $0x120] sm:$0xff]  }
 0x20c   :  { %2473 = vmatpush1.bf16.msra.mxu0 %v4128_v53  ;;  %v4207_v53 = vld [vmem:[#allocation10 + $0x1a0] sm:$0xff]  }
 0x20d   :  { %2555 = vmatpush1.bf16.msra.mxu1 %v4131_v54  ;;  %2474 = vmatprep.subr.bf16.mxu0 %v4136_v55  ;;  %v4208_v54 = vld [vmem:[#allocation10 + $0x168] sm:$0xff]  }
 0x20e   :  { %2556 = vmatprep.subr.bf16.mxu1 %v4139_v57  ;;  %v4209_v55 = vld [vmem:[#allocation10 + $0x1e8] sm:$0xff]  }
 0x20f   :  { %v4210_v57 = vld [vmem:[#allocation10 + $0x128] sm:$0xff]  }
 0x210   :  { %2475 = vmatpush1.bf16.msra.mxu0 %v4134_v58  ;;  %v4211_v58 = vld [vmem:[#allocation10 + $0x1a8] sm:$0xff]  }
 0x211   :  { %2557 = vmatpush1.bf16.msra.mxu1 %v4137_v62  ;;  %2476 = vmatprep.subr.bf16.mxu0 %v4142_v63 }
 0x212   :  { %2558 = vmatprep.subr.bf16.mxu1 %v4145_v2  ;;  %v4212_v2 = vld [vmem:[#allocation10 + $0x170] sm:$0xff]  }
 0x214   :  { %2477 = vmatpush1.bf16.msra.mxu0 %v4140_v3  ;;  %v4213_v3 = vld [vmem:[#allocation10 + $0x1f0] sm:$0xff]  }
 0x215   :  { %2559 = vmatpush1.bf16.msra.mxu1 %v4143_v4  ;;  %2478 = vmatprep.subr.bf16.mxu0 %v4148_v5 }
 0x216   :  { %2560 = vmatprep.subr.bf16.mxu1 %v4151_v6  ;;  %v4214_v6 = vld [vmem:[#allocation10 + $0x130] sm:$0xff]  }
 0x218   :  { %2479 = vmatpush1.bf16.msra.mxu0 %v4146_v60  ;;  %v4215_v60 = vld [vmem:[#allocation10 + $0x1b0] sm:$0xff]  }
 0x219   :  { %2561 = vmatpush1.bf16.msra.mxu1 %v4149_v7  ;;  %2480 = vmatprep.subr.bf16.mxu0 %v4154_v8 }
 0x21a   :  { %2562 = vmatprep.subr.bf16.mxu1 %v4157_v61 }
 0x21c   :  { %2481 = vmatpush1.bf16.msra.mxu0 %v4152_v9 }
 0x21d   :  { %2563 = vmatpush1.bf16.msra.mxu1 %v4155_v11  ;;  %2482 = vmatprep.subr.bf16.mxu0 %v4160_v12  ;;  %v4216_v11 = vld [vmem:[#allocation10 + $0x178] sm:$0xff]  }
 0x21e   :  { %2564 = vmatprep.subr.bf16.mxu1 %v4163_v13  ;;  %v4217_v12 = vld [vmem:[#allocation10 + $0x1f8] sm:$0xff]  }
 0x21f   :  { %v4218_v13 = vld [vmem:[#allocation10 + $0x138] sm:$0xff]  }
 0x220   :  { %2483 = vmatpush1.bf16.msra.mxu0 %v4158_v16  ;;  %v4219_v16 = vld [vmem:[#allocation10 + $0x1b8] sm:$0xff]  }
 0x221   :  { %2565 = vmatpush1.bf16.msra.mxu1 %v4161_v17  ;;  %2484 = vmatprep.subr.bf16.mxu0 %v4166_v19  ;;  %v4220_v17 = vld [vmem:[#allocation10 + $0x40] sm:$0xff]  }
 0x222   :  { %2566 = vmatprep.subr.bf16.mxu1 %v4169_v20  ;;  %v4221_v19 = vld [vmem:[#allocation10 + $0xc0] sm:$0xff]   ;;  %v4642_v20 = vld [vmem:[#allocation12 + $0x8] sm:$0xf] }
 0x224   :  { %2485 = vmatpush1.bf16.msra.mxu0 %v4164_v0  ;;  %v120_v0 = vld [vmem:[#allocation12 + $0xc] sm:$0xf] }
 0x225   :  { %2567 = vmatpush1.bf16.msra.mxu1 %v4167_v21  ;;  %2486 = vmatprep.subr.bf16.mxu0 %v4172_v45  ;;  %v804_v21 = vrot.slane %v4642_v20, %v4605_v15  ;;  %v1762_v45 = vrot.slane %v120_v0, %v4603_v14 }
 0x226   :  { %2568 = vmatprep.subr.bf16.mxu1 %v4175_v22  ;;  %v812_v22 = vrot.slane %v4642_v20, %v4613_v26 }
 0x228   :  { %2487 = vmatpush1.bf16.msra.mxu0 %v4170_v24  ;;  %v1770_v24 = vrot.slane %v120_v0, %v4611_v23 }
 0x229   :  { %2569 = vmatpush1.bf16.msra.mxu1 %v4173_v59  ;;  %2488 = vmatprep.subr.bf16.mxu0 %v4178_v1  ;;  %v1766_v59 = vrot.slane %v120_v0, %v4605_v15  ;;  %v1774_v1 = vrot.slane %v120_v0, %v4613_v26  ;;  %v4245_v0 = vld [vmem:[#allocation10 + $0xf0] sm:$0xff]  }
 0x22a   :  { %2570 = vmatprep.subr.bf16.mxu1 %v4181_v25 }
 0x22c   :  { %2489 = vmatpush1.bf16.msra.mxu0 %v4176_v27 }
 0x22d   :  { %2571 = vmatpush1.bf16.msra.mxu1 %v4179_v28  ;;  %2490 = vmatprep.subr.bf16.mxu0 %v4184_v29 }
 0x22e   :  { %2572 = vmatprep.subr.bf16.mxu1 %v4187_v30 }
 0x230   :  { %2491 = vmatpush1.bf16.msra.mxu0 %v4182_v31 }
 0x231   :  { %2573 = vmatpush1.bf16.msra.mxu1 %v4185_v56  ;;  %3662 = vmatprep.subr.bf16.mxu0 %v4188_v33 }
 0x232   :  { %3684 = vmatprep.subr.bf16.mxu1 %v4189_v34 }
 0x233   :  { %2493 = vmatmul.mubr.bf16.vlgmr.msra.gmra.mrb[20].mxu0 %v666_v35 }
 0x234   :  { %2575 = vmatmul.mubr.bf16.vlgmr.msra.gmra.mrb[20].mxu1 %v666_v35  ;;  %3663 = vmatpush3.bf16.msra.mxu0 %v4190_v18 }
 0x235   :  { %3685 = vmatpush3.bf16.msra.mxu1 %v4191_v36  ;;  %3664 = vmatprep.subr.bf16.mxu0 %v4192_v37 }
 0x236   :  { %3686 = vmatprep.subr.bf16.mxu1 %v4193_v38 }
 0x238   :  { %3665 = vmatpush3.bf16.msra.mxu0 %v4194_v39 }
 0x239   :  { %3687 = vmatpush3.bf16.msra.mxu1 %v4195_v10  ;;  %3666 = vmatprep.subr.bf16.mxu0 %v4196_v40 }
 0x23a   :  { %3688 = vmatprep.subr.bf16.mxu1 %v4197_v41 }
 0x23c   :  { %3667 = vmatpush3.bf16.msra.mxu0 %v4198_v42  ;;  %v4222_v42 = vld [vmem:[#allocation10] sm:$0xff]  }
 0x23d   :  { %3689 = vmatpush3.bf16.msra.mxu1 %v4199_v43  ;;  %3668 = vmatprep.subr.bf16.mxu0 %v4200_v44 }
 0x23e   :  { %3690 = vmatprep.subr.bf16.mxu1 %v4201_v46  ;;  %v4223_v46 = vld [vmem:[#allocation10 + $0x80] sm:$0xff]  }
 0x240   :  { %3669 = vmatpush3.bf16.msra.mxu0 %v4202_v48 }
 0x241   :  { %3691 = vmatpush3.bf16.msra.mxu1 %v4203_v49  ;;  %3670 = vmatprep.subr.bf16.mxu0 %v4204_v50  ;;  %v4224_v49 = vld [vmem:[#allocation10 + $0x48] sm:$0xff]  }
 0x242   :  { %3692 = vmatprep.subr.bf16.mxu1 %v4205_v51  ;;  %v4225_v51 = vld [vmem:[#allocation10 + $0xc8] sm:$0xff]  }
 0x244   :  { %3671 = vmatpush3.bf16.msra.mxu0 %v4206_v52 }
 0x245   :  { %3693 = vmatpush3.bf16.msra.mxu1 %v4207_v53  ;;  %3672 = vmatprep.subr.bf16.mxu0 %v4208_v54  ;;  %v4226_v53 = vld [vmem:[#allocation10 + $0x8] sm:$0xff]  }
 0x246   :  { %3694 = vmatprep.subr.bf16.mxu1 %v4209_v55  ;;  %v4227_v54 = vld [vmem:[#allocation10 + $0x88] sm:$0xff]   ;;  %v4228_v55 = vld [vmem:[#allocation10 + $0x50] sm:$0xff]  }
 0x248   :  { %3673 = vmatpush3.bf16.msra.mxu0 %v4210_v57  ;;  %v4229_v57 = vld [vmem:[#allocation10 + $0xd0] sm:$0xff]  }
 0x249   :  { %3695 = vmatpush3.bf16.msra.mxu1 %v4211_v58  ;;  %3674 = vmatprep.subr.bf16.mxu0 %v4212_v2  ;;  %v4230_v58 = vld [vmem:[#allocation10 + $0x10] sm:$0xff]  }
 0x24a   :  { %3696 = vmatprep.subr.bf16.mxu1 %v4213_v3  ;;  %v4231_v2 = vld [vmem:[#allocation10 + $0x90] sm:$0xff]   ;;  %v4232_v3 = vld [vmem:[#allocation10 + $0x58] sm:$0xff]  }
 0x24c   :  { %3675 = vmatpush3.bf16.msra.mxu0 %v4214_v6  ;;  %v4235_v6 = vld [vmem:[#allocation10 + $0x98] sm:$0xff]  }
 0x24d   :  { %3697 = vmatpush3.bf16.msra.mxu1 %v4215_v60  ;;  %3676 = vmatprep.subr.bf16.mxu0 %v4216_v11  ;;  %v4236_v60 = vld [vmem:[#allocation10 + $0x60] sm:$0xff]   ;;  %v4241_v11 = vld [vmem:[#allocation10 + $0xe8] sm:$0xff]  }
 0x24e   :  { %3698 = vmatprep.subr.bf16.mxu1 %v4217_v12  ;;  %v4242_v12 = vld [vmem:[#allocation10 + $0x28] sm:$0xff]  }
 0x250   :  { %3677 = vmatpush3.bf16.msra.mxu0 %v4218_v13  ;;  %v800_v13 = vrot.slane %v4642_v20, %v4603_v14  ;;  %v4249_v14 = vld [vmem:[#allocation10 + $0xf8] sm:$0xff]  }
 0x251   :  { %3699 = vmatpush3.bf16.msra.mxu1 %v4219_v16  ;;  %3706 = vmatprep.subr.bf16.mxu0 %v4220_v17  ;;  %v4243_v16 = vld [vmem:[#allocation10 + $0xa8] sm:$0xff]   ;;  %v4244_v17 = vld [vmem:[#allocation10 + $0x70] sm:$0xff]  }
 0x252   :  { %3728 = vmatprep.subr.bf16.mxu1 %v4221_v19  ;;  %v808_v19 = vrot.slane %v4642_v20, %v4611_v23  ;;  %v4251_v23 = vld [vmem:[#allocation10 + $0xb8] sm:$0xff]  }
 0x286   :  { %v4638_v62 = vpop.f32.mrb[16].mxu0  ;;  %v4640_v63 = vpop.f32.mrb[16].mxu1 }
 0x287   :  { %v1534_v4 = vpop.f32.mrb[17].mxu0  ;;  %v1616_v5 = vpop.f32.mrb[17].mxu1 }
 0x288   :  { %v1536_v7 = vpop.f32.mrb[18].mxu0  ;;  %v1618_v8 = vpop.f32.mrb[18].mxu1  ;;  %v3751_v27 = vadd.f32 %v1534_v4, %v804_v21  ;;  %v3753_v31 = vadd.f32 %v1616_v5, %v812_v22  ;;  %v4233_v4 = vld [vmem:[#allocation10 + $0xd8] sm:$0xff]   ;;  %v4246_v21 = vld [vmem:[#allocation10 + $0x30] sm:$0xff]  }
 0x289   :  { %v1537_v61 = vpop.f32.mrb[19].mxu0  ;;  %v1619_v9 = vpop.f32.mrb[19].mxu1  ;;  %v4234_v5 = vld [vmem:[#allocation10 + $0x18] sm:$0xff]   ;;  %v4237_v7 = vld [vmem:[#allocation10 + $0xe0] sm:$0xff]   ;;  %v4247_v22 = vld [vmem:[#allocation10 + $0xb0] sm:$0xff]  }
 0x28a   :  { %v1622_v15 = vmax.f32 %v3751_v27, 0.0  ;;  %v1624_v26 = vmax.f32 %v3753_v31, 0.0  ;;  %v4238_v8 = vld [vmem:[#allocation10 + $0x20] sm:$0xff]   ;;  %v4240_v9 = vld [vmem:[#allocation10 + $0x68] sm:$0xff]  }
 0x28b   :  { %v4239_v61 = vld [vmem:[#allocation10 + $0xa0] sm:$0xff]  }
 0x28c   :  { %v1626_v50 = vpack.c.bf16 %v1622_v15, %v1622_v15  ;;  %v1628_v52 = vpack.c.bf16 %v1624_v26, %v1624_v26 }
 0x306   :  { %v2494_v25 = vpop.f32.mrb[20].mxu0 }
 0x307   :  { %v3754_v28 = vadd.f32 %v2494_v25, %v1762_v45  ;;  %v2576_v29 = vpop.f32.mrb[20].mxu1  ;;  %v2496_v30 = vpop.f32.mrb[21].mxu0  ;;  %v3750_v45 = vadd.f32 %v4638_v62, %v800_v13 }
 0x308   :  { %v3756_v32 = vadd.f32 %v2576_v29, %v1770_v24  ;;  %v3755_v56 = vadd.f32 %v2496_v30, %v1766_v59  ;;  %v2578_v33 = vpop.f32.mrb[21].mxu1  ;;  %v2498_v34 = vpop.f32.mrb[22].mxu0  ;;  %v4248_v24 = vld [vmem:[#allocation10 + $0x78] sm:$0xff]   ;;  %v3752_v59 = vadd.f32 %v4640_v63, %v808_v19 }
 0x309   :  { %v2583_v18 = vmax.f32 %v3754_v28, 0.0  ;;  %v3757_v35 = vadd.f32 %v2578_v33, %v1774_v1  ;;  %v2580_v36 = vpop.f32.mrb[22].mxu1  ;;  %v2499_v37 = vpop.f32.mrb[23].mxu0  ;;  %v4250_v1 = vld [vmem:[#allocation10 + $0x38] sm:$0xff]   ;;  %v1621_v25 = vmax.f32 %v3750_v45, 0.0 }
 0x30a   :  { %v2585_v38 = vmax.f32 %v3756_v32, 0.0  ;;  %v2584_v39 = vmax.f32 %v3755_v56, 0.0  ;;  %v2581_v10 = vpop.f32.mrb[23].mxu1  ;;  %v1623_v20 = vmax.f32 %v3752_v59, 0.0 }
 0x30b   :  { %v2586_v40 = vmax.f32 %v3757_v35, 0.0  ;;  %v2587_v43 = vpack.c.bf16 %v2583_v18, %v2583_v18  ;;  %v1625_v27 = vpack.c.bf16 %v1621_v25, %v1621_v25 }
 0x30c   :  { %v2588_v41 = vpack.c.bf16 %v2584_v39, %v2584_v39  ;;  %v2589_v48 = vpack.c.bf16 %v2585_v38, %v2585_v38  ;;  %v1627_v62 = vpack.c.bf16 %v1623_v20, %v1623_v20 }
 0x30d   :  { %v2590_v44 = vpack.c.bf16 %v2586_v40, %v2586_v40 }
 0x30e   :  { %2944 = vmatprep.mubr.bf16.mxu0 %v2588_v41 }
 0x30f   :  { %2984 = vmatprep.mubr.bf16.mxu1 %v2590_v44  ;;  %2945 = vmatmul.mubr.bf16.vlgmr.msra.gmra.mrb[24].mxu0 %v2587_v43  ;;  %v3661_v44 = vld [vmem:[#allocation12 + $0x10] ss:$0 sm:$0xff] }
 0x310   :  { %2985 = vmatmul.mubr.bf16.vlgmr.msra.gmra.mrb[24].mxu1 %v2589_v48  ;;  %3707 = vmatpush3.bf16.msra.mxu0 %v4222_v42 }
 0x311   :  { %3729 = vmatpush3.bf16.msra.mxu1 %v4223_v46  ;;  %3216 = vmatprep.mubr.bf16.mxu0 %v1626_v50 }
 0x312   :  { %3256 = vmatprep.mubr.bf16.mxu1 %v1628_v52  ;;  %3708 = vmatprep.subr.bf16.mxu0 %v4224_v49 }
 0x313   :  { %3730 = vmatprep.subr.bf16.mxu1 %v4225_v51 }
 0x314   :  { %3709 = vmatpush3.bf16.msra.mxu0 %v4226_v53 }
 0x315   :  { %3731 = vmatpush3.bf16.msra.mxu1 %v4227_v54  ;;  %3710 = vmatprep.subr.bf16.mxu0 %v4228_v55  ;;  %v3272_v54 = vand.u32 127, %v604_v47 }
 0x316   :  { %3732 = vmatprep.subr.bf16.mxu1 %v4229_v57 }
 0x317   :  { %vm3273_vm3 = vcmp.ge.s32.totalorder %v3272_v54, 24  ;;  %vm3274_vm4 = vcmp.lt.s32.totalorder %v3272_v54, 48 }
 0x318   :  { %3711 = vmatpush3.bf16.msra.mxu0 %v4230_v58  ;;  %vm3275_vm7 = vmand %vm3273_vm3, %vm3274_vm4 }
 0x319   :  { %3733 = vmatpush3.bf16.msra.mxu1 %v4231_v2  ;;  %3712 = vmatprep.subr.bf16.mxu0 %v4232_v3 }
 0x31a   :  { %3734 = vmatprep.subr.bf16.mxu1 %v4233_v4 }
 0x31c   :  { %3713 = vmatpush3.bf16.msra.mxu0 %v4234_v5 }
 0x31d   :  { %3735 = vmatpush3.bf16.msra.mxu1 %v4235_v6  ;;  %3714 = vmatprep.subr.bf16.mxu0 %v4236_v60 }
 0x31e   :  { %3736 = vmatprep.subr.bf16.mxu1 %v4237_v7 }
 0x320   :  { %3715 = vmatpush3.bf16.msra.mxu0 %v4238_v8 }
 0x321   :  { %3737 = vmatpush3.bf16.msra.mxu1 %v4239_v61  ;;  %3716 = vmatprep.subr.bf16.mxu0 %v4240_v9 }
 0x322   :  { %3738 = vmatprep.subr.bf16.mxu1 %v4241_v11 }
 0x324   :  { %3717 = vmatpush3.bf16.msra.mxu0 %v4242_v12 }
 0x325   :  { %3739 = vmatpush3.bf16.msra.mxu1 %v4243_v16  ;;  %3718 = vmatprep.subr.bf16.mxu0 %v4244_v17 }
 0x326   :  { %3740 = vmatprep.subr.bf16.mxu1 %v4245_v0 }
 0x328   :  { %3719 = vmatpush3.bf16.msra.mxu0 %v4246_v21 }
 0x329   :  { %3741 = vmatpush3.bf16.msra.mxu1 %v4247_v22  ;;  %3720 = vmatprep.subr.bf16.mxu0 %v4248_v24 }
 0x32a   :  { %3742 = vmatprep.subr.bf16.mxu1 %v4249_v14 }
 0x32c   :  { %3721 = vmatpush3.bf16.msra.mxu0 %v4250_v1 }
 0x32d   :  { %3743 = vmatpush3.bf16.msra.mxu1 %v4251_v23 }
 0x32f   :  { %3217 = vmatmul.mubr.bf16.vlgmr.msra.gmra.mrb[28].mxu0 %v1625_v27 }
 0x330   :  { %3257 = vmatmul.mubr.bf16.vlgmr.msra.gmra.mrb[28].mxu1 %v1627_v62 }
 0x3e2   :  { %v3678_v28 = vpop.f32.mrb[24].mxu0 }
 0x3e3   :  { %v3700_v29 = vpop.f32.mrb[24].mxu1  ;;  %v3679_v30 = vpop.f32.mrb[25].mxu0 }
 0x3e4   :  { %v3680_v63 = vadd.f32 %v3679_v30, %v3678_v28  ;;  %v3701_v31 = vpop.f32.mrb[25].mxu1  ;;  %v3681_v32 = vpop.f32.mrb[26].mxu0 }
 0x3e5   :  { %v3702_v56 = vadd.f32 %v3701_v31, %v3700_v29  ;;  %v3703_v33 = vpop.f32.mrb[26].mxu1  ;;  %v3682_v34 = vpop.f32.mrb[27].mxu0 }
 0x3e6   :  { %v3704_v18 = vpop.f32.mrb[27].mxu1 }
 0x3e7   :  { %v2987_v35 = vadd.f32 %v3702_v56, %v3680_v63 }
 0x402   :  { %v3722_v36 = vpop.f32.mrb[28].mxu0 }
 0x403   :  { %v3744_v37 = vpop.f32.mrb[28].mxu1  ;;  %v3723_v38 = vpop.f32.mrb[29].mxu0 }
 0x404   :  { %v3724_v39 = vadd.f32 %v3723_v38, %v3722_v36  ;;  %v3745_v10 = vpop.f32.mrb[29].mxu1  ;;  %v3725_v15 = vpop.f32.mrb[30].mxu0 }
 0x405   :  { %v3746_v40 = vadd.f32 %v3745_v10, %v3744_v37  ;;  %v3747_v26 = vpop.f32.mrb[30].mxu1  ;;  %v3726_v41 = vpop.f32.mrb[31].mxu0 }
 0x406   :  { %v3219_v42 = vadd.f32 %v3724_v39, %v2987_v35  ;;  %v3748_v43 = vpop.f32.mrb[31].mxu1 }
 0x408   :  { %v3259_v46 = vadd.f32 %v3746_v40, %v3219_v42 }
 0x40a   :  { %v3270_v48 = vadd.f32 %v3661_v44, %v3259_v46 }
 0x40c   :  { %v3277_v49 = vmin.f32 %v3270_v48, 20.0  ;;  %vm3276_vm6 = vcmp.gt.f32.partialorder %v3270_v48, 20.0 }
 0x40e   :  { %v3278_v50 = vmul.f32 1.442695, %v3277_v49 }
 0x410   :  { %4252 = vpow2.f32 %v3278_v50 }
 0x41a   :  { %v4253_v51 = vpop.eup %4252 }
 0x41b   :  { %v3280_v52 = vadd.f32 1.0, %v4253_v51  ;;  %v3283_v53 = vmul.f32 -0.5, %v4253_v51  ;;  %v3286_v57 = vand.u32 2147483647, %v4253_v51 }
 0x41d   :  { %4254 = vlog2.f32 %v3280_v52  ;;  %v3284_v55 = vadd.f32 1.0, %v3283_v53  ;;  %vm3287_vm5 = vcmp.lt.f32.partialorder %v3286_v57, 0.0004427343 }
 0x41f   :  { %v3285_v3 = vmul.f32 %v4253_v51, %v3284_v55 }
 0x427   :  { %v4255_v58 = vpop.eup %4254 }
 0x428   :  { %v3282_v2 = vmul.f32 0.6931472, %v4255_v58 }
 0x42a   :  { %v3288_v4 = vsel %vm3287_vm5, %v3285_v3, %v3282_v2 }
 0x42b   :  { %v3289_v5 = vsel %vm3276_vm6, %v3270_v48, %v3288_v4 }
 0x42c   :  { %v3290_v6 = vadd.f32 1e-06, %v3289_v5 }
 0x42e   :  { %v3291_v60 = vsel %vm3275_vm7, %v3290_v6, %v3270_v48 }
 0x42f   :  { %3292 = vst [vmem:[%s4669_s7] sm:$0xff] %v3291_v60 }
 0x430   :  { %3297 = vsyncpa [#allocation3], 1 }
 0x431   :  { %3298 = vsyncpa [#allocation5], 1 }
 0x432   :  { %3299 = vsyncpa [#allocation8], 1 }
 0x433   :  { %3300 = vsyncpa [#allocation11], 1 }

</bundles_post_ra>
